<compile_context>
chip_gen: v5e
topology: v5e:2x2
jax: 0.10.0
libtpu: 0.0.40
codegen_flags: <defaults>
</compile_context>

<pallas_src>
import jax
import jax.numpy as jnp
import numpy as np
from jax.experimental import pallas as pl
from jax.experimental.pallas import tpu as pltpu

_EPS = 1e-5


# --------------------------------------------------------------------------------------------
# Host-built structured weights (pure layout plumbing, tiny).
# --------------------------------------------------------------------------------------------
def _band_matrix(w_hwio, w_in, w_out, stride):
    """Fold the 3 kw taps + Cin of a 3x3 conv into one banded matrix per kh tap.

    B[kh, wi*Cin+ci, wo*Cout+co] = w[kh, wi - wo*stride + 1, ci, co]
    so with rows packed as lanes l = w*Cin + c:  out_row = sum_kh x_row(kh) @ B[kh].
    Zero padding along W is implicit (out-of-range kw taps are simply absent).
    """
    kh_n, kw_n, ci_n, co_n = w_hwio.shape
    B = np.zeros((kh_n, w_in * ci_n, w_out * co_n), np.float32)
    for kh in range(kh_n):
        for wo in range(w_out):
            for kw in range(kw_n):
                wi = wo * stride + kw - 1
                if 0 <= wi < w_in:
                    B[kh, wi * ci_n:(wi + 1) * ci_n, wo * co_n:(wo + 1) * co_n] = w_hwio[kh, kw]
    return B


def _pointwise_matrix(w_io, w_in, w_out, stride):
    """Block-sparse matrix implementing a 1x1 conv (stride s) in the packed-lane layout."""
    ci_n, co_n = w_io.shape
    B = np.zeros((w_in * ci_n, w_out * co_n), np.float32)
    for wo in range(w_out):
        wi = wo * stride
        B[wi * ci_n:(wi + 1) * ci_n, wo * co_n:(wo + 1) * co_n] = w_io
    return B


def _lane_tile(v, w_out):
    """Tile a per-channel (Cout,) vector to the packed (1, Wo*Cout) lane layout."""
    return np.tile(np.asarray(v, np.float32).reshape(-1), w_out).reshape(1, -1)


# --------------------------------------------------------------------------------------------
# Kernel
# --------------------------------------------------------------------------------------------
def _make_residual_kernel(N, H, Ho, Wo, Cout, Lc, stride, use_1x1conv):
    inv_count = 1.0 / float(N * Ho * Wo)
    bf16, f32 = jnp.bfloat16, jnp.float32

    # conv1 tap plan over the dense x slab (no halo rows): output row ho, tap kh reads input row
    # stride*ho + kh - 1; out-of-range taps at the first/last output rows are skipped.
    # Entries: (kh, src row offset within sample, row count, dst row offset within sample).
    cnt2 = min(Ho, (H - 2) // stride + 1)
    tap_plan = [(1, 0, Ho, 0)]                      # kh=1 covers every output row -> written first
    if Ho > 1:
        tap_plan.append((0, stride - 1, Ho - 1, 1))
    if cnt2 > 0:
        tap_plan.append((2, 1, cnt2, 0))

    def src_slice(start, cnt):
        if stride == 1:
            return pl.ds(start, cnt)
        return pl.ds(start, cnt, stride=stride)      # strided sublane read (no selection matmul)

    def kernel(*refs):
        it = iter(refs)
        x_ref = next(it)                  # (N*H, W*Cin)      f32   dense input row slab
        B1 = next(it)                     # (3, W*Cin, Lc)    bf16  banded conv1
        g1 = next(it); be1 = next(it)     # (1, Cout)         f32
        B2 = next(it)                     # (3, Lc, Lc)       bf16  banded conv2
        g2 = next(it); be2 = next(it)     # (1, Cout)         f32
        if use_1x1conv:
            B3 = next(it)                 # (W*Cin, Lc)       bf16  1x1 shortcut
            bias3 = next(it)              # (1, Lc)           f32
        o_ref = next(it)                  # (N*Ho, Lc)        f32   output slab
        Ts = next(it)                     # scratch (N*H, Lc) f32   per-tap matmul result slab
        y1 = next(it)                     # scratch (N*(Ho+2), Lc) f32  conv1/bn1/relu (with halos)

        def bn_scale_shift(csum, csq, gamma, beta):
            # Per-channel reduction over the Wo lane groups via lane slices (exact f32, no matmul).
            ch_sum = csum[:, 0:Cout]
            ch_sq = csq[:, 0:Cout]
            for w in range(1, Wo):
                ch_sum = ch_sum + csum[:, w * Cout:(w + 1) * Cout]
                ch_sq = ch_sq + csq[:, w * Cout:(w + 1) * Cout]
            mean = ch_sum * inv_count
            var = jnp.maximum(ch_sq * inv_count - mean * mean, 0.0)   # clamp (cancellation-safe)
            scale_c = gamma * jax.lax.rsqrt(var + _EPS)               # (1, Cout)
            shift_c = beta - mean * scale_c
            scale = jnp.concatenate([scale_c] * Wo, axis=1)           # tile back to packed lanes
            shift = jnp.concatenate([shift_c] * Wo, axis=1)
            return scale, shift

        # ---- y1 halo rows: only the 2 halo rows per sample are zeroed -------------------------
        zrow = jnp.zeros((1, Lc), f32)
        for n in range(N):
            y1[pl.ds(n * (Ho + 2), 1), :] = zrow
            y1[pl.ds(n * (Ho + 2) + Ho + 1, 1), :] = zrow

        # ---- conv1: ONE tall (N*H, W*Cin) x (W*Cin, Lc) MXU matmul per kh tap ------------------
        xb = x_ref[...].astype(bf16)
        for idx, (kh, s_off, cnt, d_off) in enumerate(tap_plan):
            Ts[...] = jnp.dot(xb, B1[kh, :, :], preferred_element_type=f32)
            for n in range(N):          # TODO(synk): move onto a grid axis at production N
                src = Ts[src_slice(n * H + s_off, cnt), :]
                dst = pl.ds(n * (Ho + 2) + 1 + d_off, cnt)
                if idx == 0:
                    y1[dst, :] = src
                else:
                    y1[dst, :] += src

        # ---- BN1 stats (halo rows are exact zeros -> whole-slab reduce is exact) + relu -------
        y_raw = y1[...]
        csum1 = jnp.sum(y_raw, axis=0, keepdims=True)
        csq1 = jnp.sum(y_raw * y_raw, axis=0, keepdims=True)
        scale1, shift1 = bn_scale_shift(csum1, csq1, g1[...], be1[...])
        scale1b = jnp.broadcast_to(scale1, (Ho, Lc))     # hoisted out of the per-sample loop
        shift1b = jnp.broadcast_to(shift1, (Ho, Lc))
        for n in range(N):
            ib = n * (Ho + 2) + 1
            seg = y_raw[ib:ib + Ho, :]                   # raw values already in registers
            y1[pl.ds(ib, Ho), :] = jnp.maximum(seg * scale1b + shift1b, 0.0)  # halos stay zero

        # ---- conv2: one tall matmul per tap; raw result staged in o_ref ------------------------
        y1b = y1[...].astype(bf16)
        for kh in range(3):
            Tk = jnp.dot(y1b, B2[kh, :, :], preferred_element_type=f32)
            for n in range(N):
                src = Tk[n * (Ho + 2) + kh: n * (Ho + 2) + kh + Ho, :]
                if kh == 0:
                    o_ref[pl.ds(n * Ho, Ho), :] = src
                else:
                    o_ref[pl.ds(n * Ho, Ho), :] += src

        # ---- BN2 stats --------------------------------------------------------------------------
        o_raw = o_ref[...]
        csum2 = jnp.sum(o_raw, axis=0, keepdims=True)
        csq2 = jnp.sum(o_raw * o_raw, axis=0, keepdims=True)
        scale2, shift2 = bn_scale_shift(csum2, csq2, g2[...], be2[...])
        scale2b = jnp.broadcast_to(scale2, (Ho, Lc))
        shift2b = jnp.broadcast_to(shift2, (Ho, Lc))

        # ---- shortcut (1x1 conv as one slab matmul, or identity) + bn2 + add + relu -----------
        if use_1x1conv:
            Ts[...] = jnp.dot(x_ref[...].astype(bf16), B3[...], preferred_element_type=f32)
            bias3b = jnp.broadcast_to(bias3[...], (Ho, Lc))
        for n in range(N):
            y2 = o_raw[n * Ho:(n + 1) * Ho, :] * scale2b + shift2b
            if use_1x1conv:
                sc = Ts[src_slice(n * H, Ho), :] + bias3b
            else:
                sc = x_ref[pl.ds(n * H, H), :]           # identity (stride==1, Cin==Cout), exact f32
            o_ref[pl.ds(n * Ho, Ho), :] = jnp.maximum(y2 + sc, 0.0)

    return kernel


# --------------------------------------------------------------------------------------------
# Wrapper (accepts / returns NCHW like the PyTorch module)
# --------------------------------------------------------------------------------------------
def residual_forward(x_nchw, params, *, stride=1, use_1x1conv=False):
    N, Cin, H, W = x_nchw.shape
    Cout = params["w1"].shape[-1]
    Ho = (H - 1) // stride + 1
    Wo = (W - 1) // stride + 1
    if not use_1x1conv:
        assert stride == 1 and Cin == Cout, (
            "identity shortcut requires stride == 1 and in_channels == out_channels")

    Lin, Lc = W * Cin, Wo * Cout

    # Layout plumbing only: NCHW -> dense row slab (N*H, W*Cin) so W*C sits on the 128-lane axis.
    x_rows = jnp.transpose(x_nchw, (0, 2, 3, 1)).reshape(N * H, Lin).astype(jnp.float32)

    B1 = jnp.asarray(_band_matrix(np.asarray(params["w1"], np.float32), W, Wo, stride), jnp.bfloat16)
    B2 = jnp.asarray(_band_matrix(np.asarray(params["w2"], np.float32), Wo, Wo, 1), jnp.bfloat16)
    g1 = jnp.asarray(params["g1"], jnp.float32).reshape(1, Cout)
    be1 = jnp.asarray(params["be1"], jnp.float32).reshape(1, Cout)
    g2 = jnp.asarray(params["g2"], jnp.float32).reshape(1, Cout)
    be2 = jnp.asarray(params["be2"], jnp.float32).reshape(1, Cout)
    # conv biases b1/b2 are intentionally NOT passed: training-mode BN cancels them exactly.

    inputs = [x_rows, B1, g1, be1, B2, g2, be2]
    if use_1x1conv:
        inputs += [jnp.asarray(_pointwise_matrix(np.asarray(params["w3"], np.float32), W, Wo, stride),
                               jnp.bfloat16),
                   jnp.asarray(_lane_tile(params["b3"], Wo), jnp.float32)]

    def full_spec(a):
        nd = a.ndim
        return pl.BlockSpec(a.shape, lambda *_: (0,) * nd)

    kernel = _make_residual_kernel(N, H, Ho, Wo, Cout, Lc, stride, use_1x1conv)

    scratch = [pltpu.VMEM((N * H, Lc), jnp.float32),            # per-tap matmul result slab
               pltpu.VMEM((N * (Ho + 2), Lc), jnp.float32)]     # conv1/bn1/relu slab (with halos)

    # Derive the VMEM limit from actual slab sizes (headroom-safe on v7x's 64 MiB).
    in_bytes = sum(int(np.prod(a.shape)) * a.dtype.itemsize for a in inputs)
    out_bytes = N * Ho * Lc * 4
    scratch_bytes = (N * H * Lc + N * (Ho + 2) * Lc) * 4
    need = 2 * (in_bytes + out_bytes) + scratch_bytes
    vmem_limit = int(min(max(2 * need, 16 * 1024 * 1024), 64 * 1024 * 1024))

    out_rows = pl.pallas_call(
        kernel,
        out_shape=jax.ShapeDtypeStruct((N * Ho, Lc), jnp.float32),
        grid=(1,),
        in_specs=[full_spec(a) for a in inputs],
        out_specs=pl.BlockSpec((N * Ho, Lc), lambda *_: (0, 0)),
        scratch_shapes=scratch,
        compiler_params=pltpu.CompilerParams(
            dimension_semantics=("arbitrary",),
            vmem_limit_bytes=vmem_limit),
    )(*inputs)

    out = out_rows.reshape(N, Ho, Wo, Cout)
    return jnp.transpose(out, (0, 3, 1, 2))                      # packed rows -> NCHW


# --------------------------------------------------------------------------------------------
# Pure-JAX reference (same math, lax conv) used to validate the kernel
# --------------------------------------------------------------------------------------------
def residual_reference(x_nchw, params, *, stride=1, use_1x1conv=False):
    x = jnp.transpose(x_nchw, (0, 2, 3, 1)).astype(jnp.float32)

    def conv(inp, w, b, s, pad):
        out = jax.lax.conv_general_dilated(
            inp, w, window_strides=(s, s), padding=[(pad, pad), (pad, pad)],
            dimension_numbers=("NHWC", "HWIO", "NHWC"))
        return out + b.reshape(1, 1, 1, -1)

    def bn(y, g, b):
        mean = jnp.mean(y, axis=(0, 1, 2), keepdims=True)
        var = jnp.mean((y - mean) ** 2, axis=(0, 1, 2), keepdims=True)
        return (y - mean) * jax.lax.rsqrt(var + _EPS) * g.reshape(1, 1, 1, -1) + b.reshape(1, 1, 1, -1)

    y = jax.nn.relu(bn(conv(x, params["w1"], params["b1"], stride, 1),
                       params["g1"], params["be1"]))
    y = bn(conv(y, params["w2"], params["b2"], 1, 1), params["g2"], params["be2"])
    if use_1x1conv:
        w3 = params["w3"].reshape(1, 1, *params["w3"].shape)
        xr = conv(x, w3, params["b3"], stride, 0)
    else:
        xr = x
    out = jax.nn.relu(y + xr)
    return jnp.transpose(out, (0, 3, 1, 2))


def init_params(key, in_channels, out_channels, use_1x1conv):
    """Deterministic synthetic parameters matching the nn.Module's shapes (HWIO conv weights)."""
    ks = jax.random.split(key, 11)
    f32 = jnp.float32
    p = dict(
        w1=0.1 * jax.random.normal(ks[0], (3, 3, in_channels, out_channels), f32),
        b1=0.1 * jax.random.normal(ks[1], (1, out_channels), f32),
        g1=1.0 + 0.1 * jax.random.normal(ks[2], (1, out_channels), f32),
        be1=0.1 * jax.random.normal(ks[3], (1, out_channels), f32),
        w2=0.1 * jax.random.normal(ks[4], (3, 3, out_channels, out_channels), f32),
        b2=0.1 * jax.random.normal(ks[5], (1, out_channels), f32),
        g2=1.0 + 0.1 * jax.random.normal(ks[6], (1, out_channels), f32),
        be2=0.1 * jax.random.normal(ks[7], (1, out_channels), f32),
    )
    if use_1x1conv:
        p["w3"] = 0.1 * jax.random.normal(ks[8], (in_channels, out_channels), f32)
        p["b3"] = 0.1 * jax.random.normal(ks[9], (1, out_channels), f32)
    return p


if __name__ == "__main__":
    key = jax.random.PRNGKey(0)
    kx, kpA, kpB, kpC = jax.random.split(key, 4)

    # PyTorch-style NCHW input
    x = jax.random.normal(kx, (2, 4, 16, 16), jnp.float32)

    # bf16 MXU operands -> compare against the f32 reference with a bf16-appropriate tolerance.
    TOL = dict(rtol=2e-2, atol=2e-2)

    # Config A: identity shortcut (in == out channels, stride=1)
    pA = init_params(kpA, 4, 4, use_1x1conv=False)
    outA = residual_forward(x, pA, stride=1, use_1x1conv=False)
    jax.block_until_ready(outA)
    refA = residual_reference(x, pA, stride=1, use_1x1conv=False)
    assert outA.shape == (2, 4, 16, 16)
    np.testing.assert_allclose(np.asarray(outA), np.asarray(refA), **TOL)

    # Config B: 1x1-conv shortcut changing channels 4 -> 8, stride=1
    pB = init_params(kpB, 4, 8, use_1x1conv=True)
    outB = residual_forward(x, pB, stride=1, use_1x1conv=True)
    jax.block_until_ready(outB)
    refB = residual_reference(x, pB, stride=1, use_1x1conv=True)
    assert outB.shape == (2, 8, 16, 16)
    np.testing.assert_allclose(np.asarray(outB), np.asarray(refB), **TOL)

    # Config C: canonical ResNet downsample block, 4 -> 8 channels, stride=2, 1x1 shortcut
    pC = init_params(kpC, 4, 8, use_1x1conv=True)
    outC = residual_forward(x, pC, stride=2, use_1x1conv=True)
    jax.block_until_ready(outC)
    refC = residual_reference(x, pC, stride=2, use_1x1conv=True)
    assert outC.shape == (2, 8, 8, 8)
    np.testing.assert_allclose(np.asarray(outC), np.asarray(refC), **TOL)

    print("KERNEL_OK")
</pallas_src>

<mosaic_0001>
module attributes {stable_mosaic.version = 11 : i64} {
  func.func @kernel(%arg0: i32, %arg1: memref<32x64xf32, #tpu.memory_space<vmem>>, %arg2: memref<3x64x64xbf16, #tpu.memory_space<vmem>>, %arg3: memref<1x4xf32, #tpu.memory_space<vmem>>, %arg4: memref<1x4xf32, #tpu.memory_space<vmem>>, %arg5: memref<3x64x64xbf16, #tpu.memory_space<vmem>>, %arg6: memref<1x4xf32, #tpu.memory_space<vmem>>, %arg7: memref<1x4xf32, #tpu.memory_space<vmem>>, %arg8: memref<32x64xf32, #tpu.memory_space<vmem>>, %arg9: memref<32x64xf32, #tpu.memory_space<vmem>>, %arg10: memref<36x64xf32, #tpu.memory_space<vmem>>) attributes {dimension_semantics = [#tpu.dimension_semantics<arbitrary>], iteration_bounds = array<i64: 1>, scalar_prefetch = 0 : i64, scratch_operands = 2 : i64, tpu.core_type = #tpu.core_type<tc>, window_params = [{pipeline_mode = #tpu.pipeline_mode<synchronous>, transform_indices = @transform_0, window_bounds = array<i64: 32, 64>}, {pipeline_mode = #tpu.pipeline_mode<synchronous>, transform_indices = @transform_1, window_bounds = array<i64: 3, 64, 64>}, {pipeline_mode = #tpu.pipeline_mode<synchronous>, transform_indices = @transform_2, window_bounds = array<i64: 1, 4>}, {pipeline_mode = #tpu.pipeline_mode<synchronous>, transform_indices = @transform_3, window_bounds = array<i64: 1, 4>}, {pipeline_mode = #tpu.pipeline_mode<synchronous>, transform_indices = @transform_4, window_bounds = array<i64: 3, 64, 64>}, {pipeline_mode = #tpu.pipeline_mode<synchronous>, transform_indices = @transform_5, window_bounds = array<i64: 1, 4>}, {pipeline_mode = #tpu.pipeline_mode<synchronous>, transform_indices = @transform_6, window_bounds = array<i64: 1, 4>}, {pipeline_mode = #tpu.pipeline_mode<synchronous>, transform_indices = @transform_7, window_bounds = array<i64: 32, 64>}]} {
    %cst = arith.constant 0.000000e+00 : f32
    %0 = vector.broadcast %cst : f32 to vector<1x64xf32>
    %c0 = arith.constant 0 : index
    %c0_0 = arith.constant 0 : index
    %1 = vector.load %arg10[%c0, %c0_0] : memref<36x64xf32, #tpu.memory_space<vmem>>, vector<1x64xf32>
    tpu.vector_store %arg10[%c0, %c0_0], %0 {strides = array<i32>} : memref<36x64xf32, #tpu.memory_space<vmem>>, vector<1x64xf32>,
    %c17 = arith.constant 17 : index
    %c0_1 = arith.constant 0 : index
    %2 = vector.load %arg10[%c17, %c0_1] : memref<36x64xf32, #tpu.memory_space<vmem>>, vector<1x64xf32>
    tpu.vector_store %arg10[%c17, %c0_1], %0 {strides = array<i32>} : memref<36x64xf32, #tpu.memory_space<vmem>>, vector<1x64xf32>,
    %c18 = arith.constant 18 : index
    %c0_2 = arith.constant 0 : index
    %3 = vector.load %arg10[%c18, %c0_2] : memref<36x64xf32, #tpu.memory_space<vmem>>, vector<1x64xf32>
    tpu.vector_store %arg10[%c18, %c0_2], %0 {strides = array<i32>} : memref<36x64xf32, #tpu.memory_space<vmem>>, vector<1x64xf32>,
    %c35 = arith.constant 35 : index
    %c0_3 = arith.constant 0 : index
    %4 = vector.load %arg10[%c35, %c0_3] : memref<36x64xf32, #tpu.memory_space<vmem>>, vector<1x64xf32>
    tpu.vector_store %arg10[%c35, %c0_3], %0 {strides = array<i32>} : memref<36x64xf32, #tpu.memory_space<vmem>>, vector<1x64xf32>,
    %c0_4 = arith.constant 0 : index
    %c0_5 = arith.constant 0 : index
    %5 = vector.load %arg1[%c0_4, %c0_5] : memref<32x64xf32, #tpu.memory_space<vmem>>, vector<32x64xf32>
    %6 = arith.truncf %5 : vector<32x64xf32> to vector<32x64xbf16>
    %c1 = arith.constant 1 : index
    %c0_6 = arith.constant 0 : index
    %c0_7 = arith.constant 0 : index
    %7 = vector.load %arg2[%c1, %c0_6, %c0_7] : memref<3x64x64xbf16, #tpu.memory_space<vmem>>, vector<1x64x64xbf16>
    %8 = vector.shape_cast %7 : vector<1x64x64xbf16> to vector<64x64xbf16>
    %cst_8 = arith.constant dense<0.000000e+00> : vector<32x64xf32>
    %9 = tpu.matmul %6, %8, %cst_8 {dimension_numbers = #tpu.dot_dimension_numbers<[1], [0], [0], [1], [0, 0, 1, 1], [], []>} : vector<32x64xbf16>, vector<64x64xbf16>, vector<32x64xf32> -> vector<32x64xf32>
    %c0_9 = arith.constant 0 : index
    %c0_10 = arith.constant 0 : index
    %10 = vector.load %arg9[%c0_9, %c0_10] : memref<32x64xf32, #tpu.memory_space<vmem>>, vector<32x64xf32>
    tpu.vector_store %arg9[%c0_9, %c0_10], %9 {strides = array<i32>} : memref<32x64xf32, #tpu.memory_space<vmem>>, vector<32x64xf32>,
    %c0_11 = arith.constant 0 : index
    %c0_12 = arith.constant 0 : index
    %11 = vector.load %arg9[%c0_11, %c0_12] : memref<32x64xf32, #tpu.memory_space<vmem>>, vector<16x64xf32>
    %c1_13 = arith.constant 1 : index
    %c0_14 = arith.constant 0 : index
    %12 = vector.load %arg10[%c1_13, %c0_14] : memref<36x64xf32, #tpu.memory_space<vmem>>, vector<16x64xf32>
    tpu.vector_store %arg10[%c1_13, %c0_14], %11 {strides = array<i32>} : memref<36x64xf32, #tpu.memory_space<vmem>>, vector<16x64xf32>,
    %c16 = arith.constant 16 : index
    %c0_15 = arith.constant 0 : index
    %13 = vector.load %arg9[%c16, %c0_15] : memref<32x64xf32, #tpu.memory_space<vmem>>, vector<16x64xf32>
    %c19 = arith.constant 19 : index
    %c0_16 = arith.constant 0 : index
    %14 = vector.load %arg10[%c19, %c0_16] : memref<36x64xf32, #tpu.memory_space<vmem>>, vector<16x64xf32>
    tpu.vector_store %arg10[%c19, %c0_16], %13 {strides = array<i32>} : memref<36x64xf32, #tpu.memory_space<vmem>>, vector<16x64xf32>,
    %c0_17 = arith.constant 0 : index
    %c0_18 = arith.constant 0 : index
    %c0_19 = arith.constant 0 : index
    %15 = vector.load %arg2[%c0_17, %c0_18, %c0_19] : memref<3x64x64xbf16, #tpu.memory_space<vmem>>, vector<1x64x64xbf16>
    %16 = vector.shape_cast %15 : vector<1x64x64xbf16> to vector<64x64xbf16>
    %cst_20 = arith.constant dense<0.000000e+00> : vector<32x64xf32>
    %17 = tpu.matmul %6, %16, %cst_20 {dimension_numbers = #tpu.dot_dimension_numbers<[1], [0], [0], [1], [0, 0, 1, 1], [], []>} : vector<32x64xbf16>, vector<64x64xbf16>, vector<32x64xf32> -> vector<32x64xf32>
    %c0_21 = arith.constant 0 : index
    %c0_22 = arith.constant 0 : index
    %18 = vector.load %arg9[%c0_21, %c0_22] : memref<32x64xf32, #tpu.memory_space<vmem>>, vector<32x64xf32>
    tpu.vector_store %arg9[%c0_21, %c0_22], %17 {strides = array<i32>} : memref<32x64xf32, #tpu.memory_space<vmem>>, vector<32x64xf32>,
    %c0_23 = arith.constant 0 : index
    %c0_24 = arith.constant 0 : index
    %19 = vector.load %arg9[%c0_23, %c0_24] : memref<32x64xf32, #tpu.memory_space<vmem>>, vector<15x64xf32>
    %c2 = arith.constant 2 : index
    %c0_25 = arith.constant 0 : index
    %20 = vector.load %arg10[%c2, %c0_25] : memref<36x64xf32, #tpu.memory_space<vmem>>, vector<15x64xf32>
    %21 = arith.addf %20, %19 : vector<15x64xf32>
    %c2_26 = arith.constant 2 : index
    %c0_27 = arith.constant 0 : index
    %22 = vector.load %arg10[%c2_26, %c0_27] : memref<36x64xf32, #tpu.memory_space<vmem>>, vector<15x64xf32>
    tpu.vector_store %arg10[%c2_26, %c0_27], %21 {strides = array<i32>} : memref<36x64xf32, #tpu.memory_space<vmem>>, vector<15x64xf32>,
    %c16_28 = arith.constant 16 : index
    %c0_29 = arith.constant 0 : index
    %23 = vector.load %arg9[%c16_28, %c0_29] : memref<32x64xf32, #tpu.memory_space<vmem>>, vector<15x64xf32>
    %c20 = arith.constant 20 : index
    %c0_30 = arith.constant 0 : index
    %24 = vector.load %arg10[%c20, %c0_30] : memref<36x64xf32, #tpu.memory_space<vmem>>, vector<15x64xf32>
    %25 = arith.addf %24, %23 : vector<15x64xf32>
    %c20_31 = arith.constant 20 : index
    %c0_32 = arith.constant 0 : index
    %26 = vector.load %arg10[%c20_31, %c0_32] : memref<36x64xf32, #tpu.memory_space<vmem>>, vector<15x64xf32>
    tpu.vector_store %arg10[%c20_31, %c0_32], %25 {strides = array<i32>} : memref<36x64xf32, #tpu.memory_space<vmem>>, vector<15x64xf32>,
    %c2_33 = arith.constant 2 : index
    %c0_34 = arith.constant 0 : index
    %c0_35 = arith.constant 0 : index
    %27 = vector.load %arg2[%c2_33, %c0_34, %c0_35] : memref<3x64x64xbf16, #tpu.memory_space<vmem>>, vector<1x64x64xbf16>
    %28 = vector.shape_cast %27 : vector<1x64x64xbf16> to vector<64x64xbf16>
    %cst_36 = arith.constant dense<0.000000e+00> : vector<32x64xf32>
    %29 = tpu.matmul %6, %28, %cst_36 {dimension_numbers = #tpu.dot_dimension_numbers<[1], [0], [0], [1], [0, 0, 1, 1], [], []>} : vector<32x64xbf16>, vector<64x64xbf16>, vector<32x64xf32> -> vector<32x64xf32>
    %c0_37 = arith.constant 0 : index
    %c0_38 = arith.constant 0 : index
    %30 = vector.load %arg9[%c0_37, %c0_38] : memref<32x64xf32, #tpu.memory_space<vmem>>, vector<32x64xf32>
    tpu.vector_store %arg9[%c0_37, %c0_38], %29 {strides = array<i32>} : memref<32x64xf32, #tpu.memory_space<vmem>>, vector<32x64xf32>,
    %c1_39 = arith.constant 1 : index
    %c0_40 = arith.constant 0 : index
    %31 = vector.load %arg9[%c1_39, %c0_40] : memref<32x64xf32, #tpu.memory_space<vmem>>, vector<15x64xf32>
    %c1_41 = arith.constant 1 : index
    %c0_42 = arith.constant 0 : index
    %32 = vector.load %arg10[%c1_41, %c0_42] : memref<36x64xf32, #tpu.memory_space<vmem>>, vector<15x64xf32>
    %33 = arith.addf %32, %31 : vector<15x64xf32>
    %c1_43 = arith.constant 1 : index
    %c0_44 = arith.constant 0 : index
    %34 = vector.load %arg10[%c1_43, %c0_44] : memref<36x64xf32, #tpu.memory_space<vmem>>, vector<15x64xf32>
    tpu.vector_store %arg10[%c1_43, %c0_44], %33 {strides = array<i32>} : memref<36x64xf32, #tpu.memory_space<vmem>>, vector<15x64xf32>,
    %c17_45 = arith.constant 17 : index
    %c0_46 = arith.constant 0 : index
    %35 = vector.load %arg9[%c17_45, %c0_46] : memref<32x64xf32, #tpu.memory_space<vmem>>, vector<15x64xf32>
    %c19_47 = arith.constant 19 : index
    %c0_48 = arith.constant 0 : index
    %36 = vector.load %arg10[%c19_47, %c0_48] : memref<36x64xf32, #tpu.memory_space<vmem>>, vector<15x64xf32>
    %37 = arith.addf %36, %35 : vector<15x64xf32>
    %c19_49 = arith.constant 19 : index
    %c0_50 = arith.constant 0 : index
    %38 = vector.load %arg10[%c19_49, %c0_50] : memref<36x64xf32, #tpu.memory_space<vmem>>, vector<15x64xf32>
    tpu.vector_store %arg10[%c19_49, %c0_50], %37 {strides = array<i32>} : memref<36x64xf32, #tpu.memory_space<vmem>>, vector<15x64xf32>,
    %c0_51 = arith.constant 0 : index
    %c0_52 = arith.constant 0 : index
    %39 = vector.load %arg10[%c0_51, %c0_52] : memref<36x64xf32, #tpu.memory_space<vmem>>, vector<36x64xf32>
    %cst_53 = arith.constant dense<0.000000e+00> : vector<64xf32>
    %40 = vector.multi_reduction <add>, %39, %cst_53 [0] : vector<36x64xf32> to vector<64xf32>
    %41 = vector.shape_cast %40 : vector<64xf32> to vector<1x64xf32>
    %42 = arith.mulf %39, %39 : vector<36x64xf32>
    %cst_54 = arith.constant dense<0.000000e+00> : vector<64xf32>
    %43 = vector.multi_reduction <add>, %42, %cst_54 [0] : vector<36x64xf32> to vector<64xf32>
    %44 = vector.shape_cast %43 : vector<64xf32> to vector<1x64xf32>
    %c0_55 = arith.constant 0 : index
    %c0_56 = arith.constant 0 : index
    %45 = vector.load %arg3[%c0_55, %c0_56] : memref<1x4xf32, #tpu.memory_space<vmem>>, vector<1x4xf32>
    %c0_57 = arith.constant 0 : index
    %c0_58 = arith.constant 0 : index
    %46 = vector.load %arg4[%c0_57, %c0_58] : memref<1x4xf32, #tpu.memory_space<vmem>>, vector<1x4xf32>
    %47 = vector.extract_strided_slice %41 {offsets = [0, 0], sizes = [1, 4], strides = [1, 1]} : vector<1x64xf32> to vector<1x4xf32>
    %48 = vector.extract_strided_slice %44 {offsets = [0, 0], sizes = [1, 4], strides = [1, 1]} : vector<1x64xf32> to vector<1x4xf32>
    %49 = vector.extract_strided_slice %41 {offsets = [0, 4], sizes = [1, 4], strides = [1, 1]} : vector<1x64xf32> to vector<1x4xf32>
    %50 = arith.addf %47, %49 : vector<1x4xf32>
    %51 = vector.extract_strided_slice %44 {offsets = [0, 4], sizes = [1, 4], strides = [1, 1]} : vector<1x64xf32> to vector<1x4xf32>
    %52 = arith.addf %48, %51 : vector<1x4xf32>
    %53 = vector.extract_strided_slice %41 {offsets = [0, 8], sizes = [1, 4], strides = [1, 1]} : vector<1x64xf32> to vector<1x4xf32>
    %54 = arith.addf %50, %53 : vector<1x4xf32>
    %55 = vector.extract_strided_slice %44 {offsets = [0, 8], sizes = [1, 4], strides = [1, 1]} : vector<1x64xf32> to vector<1x4xf32>
    %56 = arith.addf %52, %55 : vector<1x4xf32>
    %57 = vector.extract_strided_slice %41 {offsets = [0, 12], sizes = [1, 4], strides = [1, 1]} : vector<1x64xf32> to vector<1x4xf32>
    %58 = arith.addf %54, %57 : vector<1x4xf32>
    %59 = vector.extract_strided_slice %44 {offsets = [0, 12], sizes = [1, 4], strides = [1, 1]} : vector<1x64xf32> to vector<1x4xf32>
    %60 = arith.addf %56, %59 : vector<1x4xf32>
    %61 = vector.extract_strided_slice %41 {offsets = [0, 16], sizes = [1, 4], strides = [1, 1]} : vector<1x64xf32> to vector<1x4xf32>
    %62 = arith.addf %58, %61 : vector<1x4xf32>
    %63 = vector.extract_strided_slice %44 {offsets = [0, 16], sizes = [1, 4], strides = [1, 1]} : vector<1x64xf32> to vector<1x4xf32>
    %64 = arith.addf %60, %63 : vector<1x4xf32>
    %65 = vector.extract_strided_slice %41 {offsets = [0, 20], sizes = [1, 4], strides = [1, 1]} : vector<1x64xf32> to vector<1x4xf32>
    %66 = arith.addf %62, %65 : vector<1x4xf32>
    %67 = vector.extract_strided_slice %44 {offsets = [0, 20], sizes = [1, 4], strides = [1, 1]} : vector<1x64xf32> to vector<1x4xf32>
    %68 = arith.addf %64, %67 : vector<1x4xf32>
    %69 = vector.extract_strided_slice %41 {offsets = [0, 24], sizes = [1, 4], strides = [1, 1]} : vector<1x64xf32> to vector<1x4xf32>
    %70 = arith.addf %66, %69 : vector<1x4xf32>
    %71 = vector.extract_strided_slice %44 {offsets = [0, 24], sizes = [1, 4], strides = [1, 1]} : vector<1x64xf32> to vector<1x4xf32>
    %72 = arith.addf %68, %71 : vector<1x4xf32>
    %73 = vector.extract_strided_slice %41 {offsets = [0, 28], sizes = [1, 4], strides = [1, 1]} : vector<1x64xf32> to vector<1x4xf32>
    %74 = arith.addf %70, %73 : vector<1x4xf32>
    %75 = vector.extract_strided_slice %44 {offsets = [0, 28], sizes = [1, 4], strides = [1, 1]} : vector<1x64xf32> to vector<1x4xf32>
    %76 = arith.addf %72, %75 : vector<1x4xf32>
    %77 = vector.extract_strided_slice %41 {offsets = [0, 32], sizes = [1, 4], strides = [1, 1]} : vector<1x64xf32> to vector<1x4xf32>
    %78 = arith.addf %74, %77 : vector<1x4xf32>
    %79 = vector.extract_strided_slice %44 {offsets = [0, 32], sizes = [1, 4], strides = [1, 1]} : vector<1x64xf32> to vector<1x4xf32>
    %80 = arith.addf %76, %79 : vector<1x4xf32>
    %81 = vector.extract_strided_slice %41 {offsets = [0, 36], sizes = [1, 4], strides = [1, 1]} : vector<1x64xf32> to vector<1x4xf32>
    %82 = arith.addf %78, %81 : vector<1x4xf32>
    %83 = vector.extract_strided_slice %44 {offsets = [0, 36], sizes = [1, 4], strides = [1, 1]} : vector<1x64xf32> to vector<1x4xf32>
    %84 = arith.addf %80, %83 : vector<1x4xf32>
    %85 = vector.extract_strided_slice %41 {offsets = [0, 40], sizes = [1, 4], strides = [1, 1]} : vector<1x64xf32> to vector<1x4xf32>
    %86 = arith.addf %82, %85 : vector<1x4xf32>
    %87 = vector.extract_strided_slice %44 {offsets = [0, 40], sizes = [1, 4], strides = [1, 1]} : vector<1x64xf32> to vector<1x4xf32>
    %88 = arith.addf %84, %87 : vector<1x4xf32>
    %89 = vector.extract_strided_slice %41 {offsets = [0, 44], sizes = [1, 4], strides = [1, 1]} : vector<1x64xf32> to vector<1x4xf32>
    %90 = arith.addf %86, %89 : vector<1x4xf32>
    %91 = vector.extract_strided_slice %44 {offsets = [0, 44], sizes = [1, 4], strides = [1, 1]} : vector<1x64xf32> to vector<1x4xf32>
    %92 = arith.addf %88, %91 : vector<1x4xf32>
    %93 = vector.extract_strided_slice %41 {offsets = [0, 48], sizes = [1, 4], strides = [1, 1]} : vector<1x64xf32> to vector<1x4xf32>
    %94 = arith.addf %90, %93 : vector<1x4xf32>
    %95 = vector.extract_strided_slice %44 {offsets = [0, 48], sizes = [1, 4], strides = [1, 1]} : vector<1x64xf32> to vector<1x4xf32>
    %96 = arith.addf %92, %95 : vector<1x4xf32>
    %97 = vector.extract_strided_slice %41 {offsets = [0, 52], sizes = [1, 4], strides = [1, 1]} : vector<1x64xf32> to vector<1x4xf32>
    %98 = arith.addf %94, %97 : vector<1x4xf32>
    %99 = vector.extract_strided_slice %44 {offsets = [0, 52], sizes = [1, 4], strides = [1, 1]} : vector<1x64xf32> to vector<1x4xf32>
    %100 = arith.addf %96, %99 : vector<1x4xf32>
    %101 = vector.extract_strided_slice %41 {offsets = [0, 56], sizes = [1, 4], strides = [1, 1]} : vector<1x64xf32> to vector<1x4xf32>
    %102 = arith.addf %98, %101 : vector<1x4xf32>
    %103 = vector.extract_strided_slice %44 {offsets = [0, 56], sizes = [1, 4], strides = [1, 1]} : vector<1x64xf32> to vector<1x4xf32>
    %104 = arith.addf %100, %103 : vector<1x4xf32>
    %105 = vector.extract_strided_slice %41 {offsets = [0, 60], sizes = [1, 4], strides = [1, 1]} : vector<1x64xf32> to vector<1x4xf32>
    %106 = arith.addf %102, %105 : vector<1x4xf32>
    %107 = vector.extract_strided_slice %44 {offsets = [0, 60], sizes = [1, 4], strides = [1, 1]} : vector<1x64xf32> to vector<1x4xf32>
    %108 = arith.addf %104, %107 : vector<1x4xf32>
    %cst_59 = arith.constant 0.001953125 : f32
    %109 = vector.broadcast %cst_59 : f32 to vector<1x4xf32>
    %110 = arith.mulf %106, %109 : vector<1x4xf32>
    %cst_60 = arith.constant 0.001953125 : f32
    %111 = vector.broadcast %cst_60 : f32 to vector<1x4xf32>
    %112 = arith.mulf %108, %111 : vector<1x4xf32>
    %113 = arith.mulf %110, %110 : vector<1x4xf32>
    %114 = arith.subf %112, %113 : vector<1x4xf32>
    %cst_61 = arith.constant 0.000000e+00 : f32
    %115 = vector.broadcast %cst_61 : f32 to vector<1x4xf32>
    %116 = arith.maximumf %114, %115 : vector<1x4xf32>
    %cst_62 = arith.constant 9.99999974E-6 : f32
    %117 = vector.broadcast %cst_62 : f32 to vector<1x4xf32>
    %118 = arith.addf %116, %117 : vector<1x4xf32>
    %119 = math.rsqrt %118 : vector<1x4xf32>
    %120 = arith.mulf %45, %119 : vector<1x4xf32>
    %121 = arith.mulf %110, %120 : vector<1x4xf32>
    %122 = arith.subf %46, %121 : vector<1x4xf32>
    %123 = tpu.concatenate %120, %120, %120, %120, %120, %120, %120, %120, %120, %120, %120, %120, %120, %120, %120, %120 in 1 : vector<1x4xf32>, vector<1x4xf32>, vector<1x4xf32>, vector<1x4xf32>, vector<1x4xf32>, vector<1x4xf32>, vector<1x4xf32>, vector<1x4xf32>, vector<1x4xf32>, vector<1x4xf32>, vector<1x4xf32>, vector<1x4xf32>, vector<1x4xf32>, vector<1x4xf32>, vector<1x4xf32>, vector<1x4xf32> -> vector<1x64xf32>
    %124 = tpu.concatenate %122, %122, %122, %122, %122, %122, %122, %122, %122, %122, %122, %122, %122, %122, %122, %122 in 1 : vector<1x4xf32>, vector<1x4xf32>, vector<1x4xf32>, vector<1x4xf32>, vector<1x4xf32>, vector<1x4xf32>, vector<1x4xf32>, vector<1x4xf32>, vector<1x4xf32>, vector<1x4xf32>, vector<1x4xf32>, vector<1x4xf32>, vector<1x4xf32>, vector<1x4xf32>, vector<1x4xf32>, vector<1x4xf32> -> vector<1x64xf32>
    %125 = vector.shape_cast %123 : vector<1x64xf32> to vector<1x64xf32>
    %126 = vector.broadcast %125 : vector<1x64xf32> to vector<16x64xf32>
    %127 = vector.shape_cast %124 : vector<1x64xf32> to vector<1x64xf32>
    %128 = vector.broadcast %127 : vector<1x64xf32> to vector<16x64xf32>
    %129 = vector.extract_strided_slice %39 {offsets = [1, 0], sizes = [16, 64], strides = [1, 1]} : vector<36x64xf32> to vector<16x64xf32>
    %130 = arith.mulf %129, %126 : vector<16x64xf32>
    %131 = arith.addf %130, %128 : vector<16x64xf32>
    %cst_63 = arith.constant 0.000000e+00 : f32
    %132 = vector.broadcast %cst_63 : f32 to vector<16x64xf32>
    %133 = arith.maximumf %131, %132 : vector<16x64xf32>
    %c1_64 = arith.constant 1 : index
    %c0_65 = arith.constant 0 : index
    %134 = vector.load %arg10[%c1_64, %c0_65] : memref<36x64xf32, #tpu.memory_space<vmem>>, vector<16x64xf32>
    tpu.vector_store %arg10[%c1_64, %c0_65], %133 {strides = array<i32>} : memref<36x64xf32, #tpu.memory_space<vmem>>, vector<16x64xf32>,
    %135 = vector.extract_strided_slice %39 {offsets = [19, 0], sizes = [16, 64], strides = [1, 1]} : vector<36x64xf32> to vector<16x64xf32>
    %136 = arith.mulf %135, %126 : vector<16x64xf32>
    %137 = arith.addf %136, %128 : vector<16x64xf32>
    %cst_66 = arith.constant 0.000000e+00 : f32
    %138 = vector.broadcast %cst_66 : f32 to vector<16x64xf32>
    %139 = arith.maximumf %137, %138 : vector<16x64xf32>
    %c19_67 = arith.constant 19 : index
    %c0_68 = arith.constant 0 : index
    %140 = vector.load %arg10[%c19_67, %c0_68] : memref<36x64xf32, #tpu.memory_space<vmem>>, vector<16x64xf32>
    tpu.vector_store %arg10[%c19_67, %c0_68], %139 {strides = array<i32>} : memref<36x64xf32, #tpu.memory_space<vmem>>, vector<16x64xf32>,
    %c0_69 = arith.constant 0 : index
    %c0_70 = arith.constant 0 : index
    %141 = vector.load %arg10[%c0_69, %c0_70] : memref<36x64xf32, #tpu.memory_space<vmem>>, vector<36x64xf32>
    %142 = arith.truncf %141 : vector<36x64xf32> to vector<36x64xbf16>
    %c0_71 = arith.constant 0 : index
    %c0_72 = arith.constant 0 : index
    %c0_73 = arith.constant 0 : index
    %143 = vector.load %arg5[%c0_71, %c0_72, %c0_73] : memref<3x64x64xbf16, #tpu.memory_space<vmem>>, vector<1x64x64xbf16>
    %144 = vector.shape_cast %143 : vector<1x64x64xbf16> to vector<64x64xbf16>
    %cst_74 = arith.constant dense<0.000000e+00> : vector<36x64xf32>
    %145 = tpu.matmul %142, %144, %cst_74 {dimension_numbers = #tpu.dot_dimension_numbers<[1], [0], [0], [1], [0, 0, 1, 1], [], []>} : vector<36x64xbf16>, vector<64x64xbf16>, vector<36x64xf32> -> vector<36x64xf32>
    %146 = vector.extract_strided_slice %145 {offsets = [0, 0], sizes = [16, 64], strides = [1, 1]} : vector<36x64xf32> to vector<16x64xf32>
    %c0_75 = arith.constant 0 : index
    %c0_76 = arith.constant 0 : index
    %147 = vector.load %arg8[%c0_75, %c0_76] : memref<32x64xf32, #tpu.memory_space<vmem>>, vector<16x64xf32>
    tpu.vector_store %arg8[%c0_75, %c0_76], %146 {strides = array<i32>} : memref<32x64xf32, #tpu.memory_space<vmem>>, vector<16x64xf32>,
    %148 = vector.extract_strided_slice %145 {offsets = [18, 0], sizes = [16, 64], strides = [1, 1]} : vector<36x64xf32> to vector<16x64xf32>
    %c16_77 = arith.constant 16 : index
    %c0_78 = arith.constant 0 : index
    %149 = vector.load %arg8[%c16_77, %c0_78] : memref<32x64xf32, #tpu.memory_space<vmem>>, vector<16x64xf32>
    tpu.vector_store %arg8[%c16_77, %c0_78], %148 {strides = array<i32>} : memref<32x64xf32, #tpu.memory_space<vmem>>, vector<16x64xf32>,
    %c1_79 = arith.constant 1 : index
    %c0_80 = arith.constant 0 : index
    %c0_81 = arith.constant 0 : index
    %150 = vector.load %arg5[%c1_79, %c0_80, %c0_81] : memref<3x64x64xbf16, #tpu.memory_space<vmem>>, vector<1x64x64xbf16>
    %151 = vector.shape_cast %150 : vector<1x64x64xbf16> to vector<64x64xbf16>
    %cst_82 = arith.constant dense<0.000000e+00> : vector<36x64xf32>
    %152 = tpu.matmul %142, %151, %cst_82 {dimension_numbers = #tpu.dot_dimension_numbers<[1], [0], [0], [1], [0, 0, 1, 1], [], []>} : vector<36x64xbf16>, vector<64x64xbf16>, vector<36x64xf32> -> vector<36x64xf32>
    %153 = vector.extract_strided_slice %152 {offsets = [1, 0], sizes = [16, 64], strides = [1, 1]} : vector<36x64xf32> to vector<16x64xf32>
    %c0_83 = arith.constant 0 : index
    %c0_84 = arith.constant 0 : index
    %154 = vector.load %arg8[%c0_83, %c0_84] : memref<32x64xf32, #tpu.memory_space<vmem>>, vector<16x64xf32>
    %155 = arith.addf %154, %153 : vector<16x64xf32>
    %c0_85 = arith.constant 0 : index
    %c0_86 = arith.constant 0 : index
    %156 = vector.load %arg8[%c0_85, %c0_86] : memref<32x64xf32, #tpu.memory_space<vmem>>, vector<16x64xf32>
    tpu.vector_store %arg8[%c0_85, %c0_86], %155 {strides = array<i32>} : memref<32x64xf32, #tpu.memory_space<vmem>>, vector<16x64xf32>,
    %157 = vector.extract_strided_slice %152 {offsets = [19, 0], sizes = [16, 64], strides = [1, 1]} : vector<36x64xf32> to vector<16x64xf32>
    %c16_87 = arith.constant 16 : index
    %c0_88 = arith.constant 0 : index
    %158 = vector.load %arg8[%c16_87, %c0_88] : memref<32x64xf32, #tpu.memory_space<vmem>>, vector<16x64xf32>
    %159 = arith.addf %158, %157 : vector<16x64xf32>
    %c16_89 = arith.constant 16 : index
    %c0_90 = arith.constant 0 : index
    %160 = vector.load %arg8[%c16_89, %c0_90] : memref<32x64xf32, #tpu.memory_space<vmem>>, vector<16x64xf32>
    tpu.vector_store %arg8[%c16_89, %c0_90], %159 {strides = array<i32>} : memref<32x64xf32, #tpu.memory_space<vmem>>, vector<16x64xf32>,
    %c2_91 = arith.constant 2 : index
    %c0_92 = arith.constant 0 : index
    %c0_93 = arith.constant 0 : index
    %161 = vector.load %arg5[%c2_91, %c0_92, %c0_93] : memref<3x64x64xbf16, #tpu.memory_space<vmem>>, vector<1x64x64xbf16>
    %162 = vector.shape_cast %161 : vector<1x64x64xbf16> to vector<64x64xbf16>
    %cst_94 = arith.constant dense<0.000000e+00> : vector<36x64xf32>
    %163 = tpu.matmul %142, %162, %cst_94 {dimension_numbers = #tpu.dot_dimension_numbers<[1], [0], [0], [1], [0, 0, 1, 1], [], []>} : vector<36x64xbf16>, vector<64x64xbf16>, vector<36x64xf32> -> vector<36x64xf32>
    %164 = vector.extract_strided_slice %163 {offsets = [2, 0], sizes = [16, 64], strides = [1, 1]} : vector<36x64xf32> to vector<16x64xf32>
    %c0_95 = arith.constant 0 : index
    %c0_96 = arith.constant 0 : index
    %165 = vector.load %arg8[%c0_95, %c0_96] : memref<32x64xf32, #tpu.memory_space<vmem>>, vector<16x64xf32>
    %166 = arith.addf %165, %164 : vector<16x64xf32>
    %c0_97 = arith.constant 0 : index
    %c0_98 = arith.constant 0 : index
    %167 = vector.load %arg8[%c0_97, %c0_98] : memref<32x64xf32, #tpu.memory_space<vmem>>, vector<16x64xf32>
    tpu.vector_store %arg8[%c0_97, %c0_98], %166 {strides = array<i32>} : memref<32x64xf32, #tpu.memory_space<vmem>>, vector<16x64xf32>,
    %168 = vector.extract_strided_slice %163 {offsets = [20, 0], sizes = [16, 64], strides = [1, 1]} : vector<36x64xf32> to vector<16x64xf32>
    %c16_99 = arith.constant 16 : index
    %c0_100 = arith.constant 0 : index
    %169 = vector.load %arg8[%c16_99, %c0_100] : memref<32x64xf32, #tpu.memory_space<vmem>>, vector<16x64xf32>
    %170 = arith.addf %169, %168 : vector<16x64xf32>
    %c16_101 = arith.constant 16 : index
    %c0_102 = arith.constant 0 : index
    %171 = vector.load %arg8[%c16_101, %c0_102] : memref<32x64xf32, #tpu.memory_space<vmem>>, vector<16x64xf32>
    tpu.vector_store %arg8[%c16_101, %c0_102], %170 {strides = array<i32>} : memref<32x64xf32, #tpu.memory_space<vmem>>, vector<16x64xf32>,
    %c0_103 = arith.constant 0 : index
    %c0_104 = arith.constant 0 : index
    %172 = vector.load %arg8[%c0_103, %c0_104] : memref<32x64xf32, #tpu.memory_space<vmem>>, vector<32x64xf32>
    %cst_105 = arith.constant dense<0.000000e+00> : vector<64xf32>
    %173 = vector.multi_reduction <add>, %172, %cst_105 [0] : vector<32x64xf32> to vector<64xf32>
    %174 = vector.shape_cast %173 : vector<64xf32> to vector<1x64xf32>
    %175 = arith.mulf %172, %172 : vector<32x64xf32>
    %cst_106 = arith.constant dense<0.000000e+00> : vector<64xf32>
    %176 = vector.multi_reduction <add>, %175, %cst_106 [0] : vector<32x64xf32> to vector<64xf32>
    %177 = vector.shape_cast %176 : vector<64xf32> to vector<1x64xf32>
    %c0_107 = arith.constant 0 : index
    %c0_108 = arith.constant 0 : index
    %178 = vector.load %arg6[%c0_107, %c0_108] : memref<1x4xf32, #tpu.memory_space<vmem>>, vector<1x4xf32>
    %c0_109 = arith.constant 0 : index
    %c0_110 = arith.constant 0 : index
    %179 = vector.load %arg7[%c0_109, %c0_110] : memref<1x4xf32, #tpu.memory_space<vmem>>, vector<1x4xf32>
    %180 = vector.extract_strided_slice %174 {offsets = [0, 0], sizes = [1, 4], strides = [1, 1]} : vector<1x64xf32> to vector<1x4xf32>
    %181 = vector.extract_strided_slice %177 {offsets = [0, 0], sizes = [1, 4], strides = [1, 1]} : vector<1x64xf32> to vector<1x4xf32>
    %182 = vector.extract_strided_slice %174 {offsets = [0, 4], sizes = [1, 4], strides = [1, 1]} : vector<1x64xf32> to vector<1x4xf32>
    %183 = arith.addf %180, %182 : vector<1x4xf32>
    %184 = vector.extract_strided_slice %177 {offsets = [0, 4], sizes = [1, 4], strides = [1, 1]} : vector<1x64xf32> to vector<1x4xf32>
    %185 = arith.addf %181, %184 : vector<1x4xf32>
    %186 = vector.extract_strided_slice %174 {offsets = [0, 8], sizes = [1, 4], strides = [1, 1]} : vector<1x64xf32> to vector<1x4xf32>
    %187 = arith.addf %183, %186 : vector<1x4xf32>
    %188 = vector.extract_strided_slice %177 {offsets = [0, 8], sizes = [1, 4], strides = [1, 1]} : vector<1x64xf32> to vector<1x4xf32>
    %189 = arith.addf %185, %188 : vector<1x4xf32>
    %190 = vector.extract_strided_slice %174 {offsets = [0, 12], sizes = [1, 4], strides = [1, 1]} : vector<1x64xf32> to vector<1x4xf32>
    %191 = arith.addf %187, %190 : vector<1x4xf32>
    %192 = vector.extract_strided_slice %177 {offsets = [0, 12], sizes = [1, 4], strides = [1, 1]} : vector<1x64xf32> to vector<1x4xf32>
    %193 = arith.addf %189, %192 : vector<1x4xf32>
    %194 = vector.extract_strided_slice %174 {offsets = [0, 16], sizes = [1, 4], strides = [1, 1]} : vector<1x64xf32> to vector<1x4xf32>
    %195 = arith.addf %191, %194 : vector<1x4xf32>
    %196 = vector.extract_strided_slice %177 {offsets = [0, 16], sizes = [1, 4], strides = [1, 1]} : vector<1x64xf32> to vector<1x4xf32>
    %197 = arith.addf %193, %196 : vector<1x4xf32>
    %198 = vector.extract_strided_slice %174 {offsets = [0, 20], sizes = [1, 4], strides = [1, 1]} : vector<1x64xf32> to vector<1x4xf32>
    %199 = arith.addf %195, %198 : vector<1x4xf32>
    %200 = vector.extract_strided_slice %177 {offsets = [0, 20], sizes = [1, 4], strides = [1, 1]} : vector<1x64xf32> to vector<1x4xf32>
    %201 = arith.addf %197, %200 : vector<1x4xf32>
    %202 = vector.extract_strided_slice %174 {offsets = [0, 24], sizes = [1, 4], strides = [1, 1]} : vector<1x64xf32> to vector<1x4xf32>
    %203 = arith.addf %199, %202 : vector<1x4xf32>
    %204 = vector.extract_strided_slice %177 {offsets = [0, 24], sizes = [1, 4], strides = [1, 1]} : vector<1x64xf32> to vector<1x4xf32>
    %205 = arith.addf %201, %204 : vector<1x4xf32>
    %206 = vector.extract_strided_slice %174 {offsets = [0, 28], sizes = [1, 4], strides = [1, 1]} : vector<1x64xf32> to vector<1x4xf32>
    %207 = arith.addf %203, %206 : vector<1x4xf32>
    %208 = vector.extract_strided_slice %177 {offsets = [0, 28], sizes = [1, 4], strides = [1, 1]} : vector<1x64xf32> to vector<1x4xf32>
    %209 = arith.addf %205, %208 : vector<1x4xf32>
    %210 = vector.extract_strided_slice %174 {offsets = [0, 32], sizes = [1, 4], strides = [1, 1]} : vector<1x64xf32> to vector<1x4xf32>
    %211 = arith.addf %207, %210 : vector<1x4xf32>
    %212 = vector.extract_strided_slice %177 {offsets = [0, 32], sizes = [1, 4], strides = [1, 1]} : vector<1x64xf32> to vector<1x4xf32>
    %213 = arith.addf %209, %212 : vector<1x4xf32>
    %214 = vector.extract_strided_slice %174 {offsets = [0, 36], sizes = [1, 4], strides = [1, 1]} : vector<1x64xf32> to vector<1x4xf32>
    %215 = arith.addf %211, %214 : vector<1x4xf32>
    %216 = vector.extract_strided_slice %177 {offsets = [0, 36], sizes = [1, 4], strides = [1, 1]} : vector<1x64xf32> to vector<1x4xf32>
    %217 = arith.addf %213, %216 : vector<1x4xf32>
    %218 = vector.extract_strided_slice %174 {offsets = [0, 40], sizes = [1, 4], strides = [1, 1]} : vector<1x64xf32> to vector<1x4xf32>
    %219 = arith.addf %215, %218 : vector<1x4xf32>
    %220 = vector.extract_strided_slice %177 {offsets = [0, 40], sizes = [1, 4], strides = [1, 1]} : vector<1x64xf32> to vector<1x4xf32>
    %221 = arith.addf %217, %220 : vector<1x4xf32>
    %222 = vector.extract_strided_slice %174 {offsets = [0, 44], sizes = [1, 4], strides = [1, 1]} : vector<1x64xf32> to vector<1x4xf32>
    %223 = arith.addf %219, %222 : vector<1x4xf32>
    %224 = vector.extract_strided_slice %177 {offsets = [0, 44], sizes = [1, 4], strides = [1, 1]} : vector<1x64xf32> to vector<1x4xf32>
    %225 = arith.addf %221, %224 : vector<1x4xf32>
    %226 = vector.extract_strided_slice %174 {offsets = [0, 48], sizes = [1, 4], strides = [1, 1]} : vector<1x64xf32> to vector<1x4xf32>
    %227 = arith.addf %223, %226 : vector<1x4xf32>
    %228 = vector.extract_strided_slice %177 {offsets = [0, 48], sizes = [1, 4], strides = [1, 1]} : vector<1x64xf32> to vector<1x4xf32>
    %229 = arith.addf %225, %228 : vector<1x4xf32>
    %230 = vector.extract_strided_slice %174 {offsets = [0, 52], sizes = [1, 4], strides = [1, 1]} : vector<1x64xf32> to vector<1x4xf32>
    %231 = arith.addf %227, %230 : vector<1x4xf32>
    %232 = vector.extract_strided_slice %177 {offsets = [0, 52], sizes = [1, 4], strides = [1, 1]} : vector<1x64xf32> to vector<1x4xf32>
    %233 = arith.addf %229, %232 : vector<1x4xf32>
    %234 = vector.extract_strided_slice %174 {offsets = [0, 56], sizes = [1, 4], strides = [1, 1]} : vector<1x64xf32> to vector<1x4xf32>
    %235 = arith.addf %231, %234 : vector<1x4xf32>
    %236 = vector.extract_strided_slice %177 {offsets = [0, 56], sizes = [1, 4], strides = [1, 1]} : vector<1x64xf32> to vector<1x4xf32>
    %237 = arith.addf %233, %236 : vector<1x4xf32>
    %238 = vector.extract_strided_slice %174 {offsets = [0, 60], sizes = [1, 4], strides = [1, 1]} : vector<1x64xf32> to vector<1x4xf32>
    %239 = arith.addf %235, %238 : vector<1x4xf32>
    %240 = vector.extract_strided_slice %177 {offsets = [0, 60], sizes = [1, 4], strides = [1, 1]} : vector<1x64xf32> to vector<1x4xf32>
    %241 = arith.addf %237, %240 : vector<1x4xf32>
    %cst_111 = arith.constant 0.001953125 : f32
    %242 = vector.broadcast %cst_111 : f32 to vector<1x4xf32>
    %243 = arith.mulf %239, %242 : vector<1x4xf32>
    %cst_112 = arith.constant 0.001953125 : f32
    %244 = vector.broadcast %cst_112 : f32 to vector<1x4xf32>
    %245 = arith.mulf %241, %244 : vector<1x4xf32>
    %246 = arith.mulf %243, %243 : vector<1x4xf32>
    %247 = arith.subf %245, %246 : vector<1x4xf32>
    %cst_113 = arith.constant 0.000000e+00 : f32
    %248 = vector.broadcast %cst_113 : f32 to vector<1x4xf32>
    %249 = arith.maximumf %247, %248 : vector<1x4xf32>
    %cst_114 = arith.constant 9.99999974E-6 : f32
    %250 = vector.broadcast %cst_114 : f32 to vector<1x4xf32>
    %251 = arith.addf %249, %250 : vector<1x4xf32>
    %252 = math.rsqrt %251 : vector<1x4xf32>
    %253 = arith.mulf %178, %252 : vector<1x4xf32>
    %254 = arith.mulf %243, %253 : vector<1x4xf32>
    %255 = arith.subf %179, %254 : vector<1x4xf32>
    %256 = tpu.concatenate %253, %253, %253, %253, %253, %253, %253, %253, %253, %253, %253, %253, %253, %253, %253, %253 in 1 : vector<1x4xf32>, vector<1x4xf32>, vector<1x4xf32>, vector<1x4xf32>, vector<1x4xf32>, vector<1x4xf32>, vector<1x4xf32>, vector<1x4xf32>, vector<1x4xf32>, vector<1x4xf32>, vector<1x4xf32>, vector<1x4xf32>, vector<1x4xf32>, vector<1x4xf32>, vector<1x4xf32>, vector<1x4xf32> -> vector<1x64xf32>
    %257 = tpu.concatenate %255, %255, %255, %255, %255, %255, %255, %255, %255, %255, %255, %255, %255, %255, %255, %255 in 1 : vector<1x4xf32>, vector<1x4xf32>, vector<1x4xf32>, vector<1x4xf32>, vector<1x4xf32>, vector<1x4xf32>, vector<1x4xf32>, vector<1x4xf32>, vector<1x4xf32>, vector<1x4xf32>, vector<1x4xf32>, vector<1x4xf32>, vector<1x4xf32>, vector<1x4xf32>, vector<1x4xf32>, vector<1x4xf32> -> vector<1x64xf32>
    %258 = vector.shape_cast %256 : vector<1x64xf32> to vector<1x64xf32>
    %259 = vector.broadcast %258 : vector<1x64xf32> to vector<16x64xf32>
    %260 = vector.shape_cast %257 : vector<1x64xf32> to vector<1x64xf32>
    %261 = vector.broadcast %260 : vector<1x64xf32> to vector<16x64xf32>
    %262 = vector.extract_strided_slice %172 {offsets = [0, 0], sizes = [16, 64], strides = [1, 1]} : vector<32x64xf32> to vector<16x64xf32>
    %263 = arith.mulf %262, %259 : vector<16x64xf32>
    %264 = arith.addf %263, %261 : vector<16x64xf32>
    %c0_115 = arith.constant 0 : index
    %c0_116 = arith.constant 0 : index
    %265 = vector.load %arg1[%c0_115, %c0_116] : memref<32x64xf32, #tpu.memory_space<vmem>>, vector<16x64xf32>
    %266 = arith.addf %264, %265 : vector<16x64xf32>
    %cst_117 = arith.constant 0.000000e+00 : f32
    %267 = vector.broadcast %cst_117 : f32 to vector<16x64xf32>
    %268 = arith.maximumf %266, %267 : vector<16x64xf32>
    %c0_118 = arith.constant 0 : index
    %c0_119 = arith.constant 0 : index
    %269 = vector.load %arg8[%c0_118, %c0_119] : memref<32x64xf32, #tpu.memory_space<vmem>>, vector<16x64xf32>
    tpu.vector_store %arg8[%c0_118, %c0_119], %268 {strides = array<i32>} : memref<32x64xf32, #tpu.memory_space<vmem>>, vector<16x64xf32>,
    %270 = vector.extract_strided_slice %172 {offsets = [16, 0], sizes = [16, 64], strides = [1, 1]} : vector<32x64xf32> to vector<16x64xf32>
    %271 = arith.mulf %270, %259 : vector<16x64xf32>
    %272 = arith.addf %271, %261 : vector<16x64xf32>
    %c16_120 = arith.constant 16 : index
    %c0_121 = arith.constant 0 : index
    %273 = vector.load %arg1[%c16_120, %c0_121] : memref<32x64xf32, #tpu.memory_space<vmem>>, vector<16x64xf32>
    %274 = arith.addf %272, %273 : vector<16x64xf32>
    %cst_122 = arith.constant 0.000000e+00 : f32
    %275 = vector.broadcast %cst_122 : f32 to vector<16x64xf32>
    %276 = arith.maximumf %274, %275 : vector<16x64xf32>
    %c16_123 = arith.constant 16 : index
    %c0_124 = arith.constant 0 : index
    %277 = vector.load %arg8[%c16_123, %c0_124] : memref<32x64xf32, #tpu.memory_space<vmem>>, vector<16x64xf32>
    tpu.vector_store %arg8[%c16_123, %c0_124], %276 {strides = array<i32>} : memref<32x64xf32, #tpu.memory_space<vmem>>, vector<16x64xf32>,
    return
  }
  func.func @transform_0(%arg0: i32) -> (i32, i32) {
    %c0_i32 = arith.constant 0 : i32
    %c0_i32_0 = arith.constant 0 : i32
    %c0_i32_1 = arith.constant 0 : i32
    return %c0_i32, %c0_i32_0 : i32, i32
  }
  func.func @transform_1(%arg0: i32) -> (i32, i32, i32) {
    %c0_i32 = arith.constant 0 : i32
    %c0_i32_0 = arith.constant 0 : i32
    %c0_i32_1 = arith.constant 0 : i32
    %c0_i32_2 = arith.constant 0 : i32
    return %c0_i32, %c0_i32_0, %c0_i32_1 : i32, i32, i32
  }
  func.func @transform_2(%arg0: i32) -> (i32, i32) {
    %c0_i32 = arith.constant 0 : i32
    %c0_i32_0 = arith.constant 0 : i32
    %c0_i32_1 = arith.constant 0 : i32
    return %c0_i32, %c0_i32_0 : i32, i32
  }
  func.func @transform_3(%arg0: i32) -> (i32, i32) {
    %c0_i32 = arith.constant 0 : i32
    %c0_i32_0 = arith.constant 0 : i32
    %c0_i32_1 = arith.constant 0 : i32
    return %c0_i32, %c0_i32_0 : i32, i32
  }
  func.func @transform_4(%arg0: i32) -> (i32, i32, i32) {
    %c0_i32 = arith.constant 0 : i32
    %c0_i32_0 = arith.constant 0 : i32
    %c0_i32_1 = arith.constant 0 : i32
    %c0_i32_2 = arith.constant 0 : i32
    return %c0_i32, %c0_i32_0, %c0_i32_1 : i32, i32, i32
  }
  func.func @transform_5(%arg0: i32) -> (i32, i32) {
    %c0_i32 = arith.constant 0 : i32
    %c0_i32_0 = arith.constant 0 : i32
    %c0_i32_1 = arith.constant 0 : i32
    return %c0_i32, %c0_i32_0 : i32, i32
  }
  func.func @transform_6(%arg0: i32) -> (i32, i32) {
    %c0_i32 = arith.constant 0 : i32
    %c0_i32_0 = arith.constant 0 : i32
    %c0_i32_1 = arith.constant 0 : i32
    return %c0_i32, %c0_i32_0 : i32, i32
  }
  func.func @transform_7(%arg0: i32) -> (i32, i32) {
    %c0_i32 = arith.constant 0 : i32
    %c0_i32_0 = arith.constant 0 : i32
    %c0_i32_1 = arith.constant 0 : i32
    return %c0_i32, %c0_i32_0 : i32, i32
  }
}

</mosaic_0001>

<bundles_post_ra>
// kernel: tpu_custom_call.1
= control target key start
LH: loop header
LB: loop body
LE: loop exit
PB: predicated region body
PF: predicated region fallthrough
CT: control target
= control target key end

     0   :  { %12 = vsyncpa [#allocation5], 0  ;;  %s1997_s0 = inlined_call_operand.hbm [shape: f32[32,64], index: 0, kind: input, shape index: {}]   ;;  %s1998_s1 = inlined_call_operand.hbm [shape: bf16[3,64,64], index: 1, kind: input, shape index: {}]   ;;  %s1999_s2 = inlined_call_operand.vmem [shape: f32[1,4], index: 2, kind: input, shape index: {}]   ;;  %s2000_s3 = inlined_call_operand.vmem [shape: f32[1,4], index: 3, kind: input, shape index: {}]   ;;  %s2001_s4 = inlined_call_operand.hbm [shape: bf16[3,64,64], index: 4, kind: input, shape index: {}]   ;;  %s2002_s5 = inlined_call_operand.vmem [shape: f32[1,4], index: 5, kind: input, shape index: {}]   ;;  %s2003_s6 = inlined_call_operand.vmem [shape: f32[1,4], index: 6, kind: input, shape index: {}]   ;;  %s2004_s7 = inlined_call_operand.hbm [shape: f32[32,64], index: 7, kind: output, shape index: {}]  }
   0x1   :  { %13 = vsyncpa [#allocation8], 0  ;;  %s32_s26 = sshll.u32 %s1998_s1, 4  ;;  %s33_s26 = int_to_ptr.hbm [resolvable:$true] %s32_s26 }
   0x2   :  { %14 = vsyncpa [#allocation6], 0  ;;  %s1536_s27 = smov [#allocation7]   ;;  %s19_s8 = sshll.u32 %s1997_s0, 4  ;;  %s20_s8 = int_to_ptr.hbm [resolvable:$true] %s19_s8 }
   0x3   :  { %s34_s28 = sshll.u32 %s1536_s27, 4  ;;  %s1537_s9 = smov 64   ;;  %s35_s28 = int_to_ptr.vmem [resolvable:$true] %s34_s28 }
   0x4   :  { %s1538_s10 = smov 4   ;;  %s1539_s11 = smov [#allocation4]  }
   0x5   :  { %40 = dma.hbm_to_vmem [thread:$0]  %s33_s26, 1536, %s35_s28, [#allocation8], %s1537_s9, %s1537_s9, %s1538_s10  }
   0x6   :  { %s21_s12 = sshll.u32 %s1539_s11, 4  ;;  %s2005_s13 = smov 128   ;;  %s22_s12 = int_to_ptr.vmem [resolvable:$true] %s21_s12 }
   0x7   :  { %s1541_s14 = smov 8   ;;  %s49_s16 = sshll.u32 %s2001_s4, 4  ;;  %s50_s16 = int_to_ptr.hbm [resolvable:$true] %s49_s16 }
   0x8   :  { %27 = dma.hbm_to_vmem [thread:$0]  %s20_s8, 512, %s22_s12, [#allocation5], %s2005_s13, %s2005_s13, %s1541_s14  }
   0x9   :  { %s1542_s0 = smov [#allocation9]  }
   0xa   :  { %s51_s17 = sshll.u32 %s1542_s0, 4  ;;  %s52_s17 = int_to_ptr.vmem [resolvable:$true] %s51_s17 }
   0xb   :  { %57 = dma.hbm_to_vmem [thread:$0]  %s50_s16, 1536, %s52_s17, [#allocation8], %s1537_s9, %s1537_s9, %s1538_s10  }
   0xc   :  { %1530 = dma.done.wait [#allocation5], 512  }
   0xd   :  { %1531 = vsyncadd [#allocation5], 4294966784 }
   0xe   :  { %1532 = dma.done.wait [#allocation8], 3072  }
   0xf   :  { %1533 = vsyncadd [#allocation8], 4294964224  ;;  %v1368_v0 = vld [vmem:[#allocation7 + $0x38] sm:$0xff]  ;;  %v1367_v2 = vld [vmem:[#allocation7 + $0x30] sm:$0xff]  ;;  %vm119_vm0 = vcmask 523264   ;;  %vm75_vm1 = vcmask 516096  }
  0x10   :  { %v1372_v1 = vld [vmem:[#allocation7 + $0x18] sm:$0xff]  ;;  %130 = vmatpush.bf16.msra.mxu2 %v1368_v0  ;;  %v1371_v3 = vld [vmem:[#allocation7 + $0x10] sm:$0xff]  ;;  %v1366_v4 = vld [vmem:[#allocation7 + $0x28] sm:$0xff]  ;;  %v1543_v26 = vmov 0.0   ;;  %vm219_vm2 = vcmask 522240   ;;  %vm313_vm3 = vcmask 519168  }
  0x11   :  { %193 = vmatpush.bf16.msra.mxu0 %v1372_v1  ;;  %1389 = vmatpush.bf16.msra.mxu1 %v1372_v1  ;;  %v1370_v5 = vld [vmem:[#allocation7 + $0x8] sm:$0xff]  ;;  %v1365_v6 = vld [vmem:[#allocation7 + $0x20] sm:$0xff]  ;;  %v1376_v9 = vld [vmem:[#allocation7 + $0x58] sm:$0xff]  ;;  %76 = vst.msk [vmem:[#allocation3] sm:$0x1] %vm75_vm1, %v1543_v26  ;;  %s1544_s4 = smov 116  }
  0x12   :  { %v80_v7 = vld [vmem:[#allocation4] sm:$0xff]  ;;  %v81_v8 = vld [vmem:[#allocation4 + $0x8] sm:$0xff]  ;;  %v82_v12 = vld [vmem:[#allocation4 + $0x10] sm:$0xff]  ;;  %77 = vst.msk [vmem:[#allocation3 + $0x11] sm:$0x1] %vm75_vm1, %v1543_v26  ;;  %s1545_s18 = smov 120  }
  0x13   :  { %v1369_v10 = vld [vmem:[#allocation7] sm:$0xff]  ;;  %v84_v11 = vpack.c.bf16 %v81_v8, %v80_v7  ;;  %v83_v13 = vld [vmem:[#allocation4 + $0x18] sm:$0xff]  ;;  %v1375_v14 = vld [vmem:[#allocation7 + $0x50] sm:$0xff]  ;;  %78 = vst.msk [vmem:[#allocation3 + $0x12] sm:$0x1] %vm75_vm1, %v1543_v26  ;;  %s1546_s19 = smov 124  }
  0x14   :  { %131 = vmatpush.bf16.msra.mxu2 %v1367_v2  ;;  %v85_v15 = vpack.c.bf16 %v83_v13, %v82_v12  ;;  %v1374_v16 = vld [vmem:[#allocation7 + $0x48] sm:$0xff]  ;;  %v1373_v17 = vld [vmem:[#allocation7 + $0x40] sm:$0xff]  ;;  %79 = vst.msk [vmem:[#allocation3 + $0x23] sm:$0x1] %vm75_vm1, %v1543_v26  ;;  %s1547_s20 = smov 108   ;;  %s1548_s21 = smov 104  }
  0x15   :  { %194 = vmatpush.bf16.msra.mxu0 %v1371_v3  ;;  %1390 = vmatpush.bf16.msra.mxu1 %v1371_v3  ;;  %s1549_s22 = smov 112   ;;  %s1550_s23 = smov 96   ;;  %vm532_vm7 = vcmask 31744   ;;  %vm534_vm8 = vcmask 64512   ;;  %vm536_vm9 = vcmask 97280   ;;  %vm538_vm10 = vcmask 130048  }
  0x16   :  { %s1551_s24 = smov 92   ;;  %s1552_s25 = smov 100   ;;  %vm540_vm11 = vcmask 162816   ;;  %vm2016_vm12 = vcmask 195584   ;;  %vm544_vm13 = vcmask 228352   ;;  %vm546_vm14 = vcmask 261120  }
  0x17   :  { %s2014_s26 = smov 84   ;;  %s1554_s27 = smov 80   ;;  %vm548_vm15 = vcmask 293888  }
  0x18   :  { %132 = vmatpush.bf16.msra.mxu2 %v1366_v4  ;;  %s2012_s28 = smov 88   ;;  %s2010_s29 = smov 72  }
  0x19   :  { %195 = vmatpush.bf16.msra.mxu0 %v1370_v5  ;;  %1391 = vmatpush.bf16.msra.mxu1 %v1370_v5  ;;  %s2008_s30 = smov 76   ;;  %s2006_s8 = smov 68  }
  0x1a   :  { %s1559_s12 = smov 12   ;;  %s1560_s1 = smov 24  }
  0x1b   :  { %s1561_s15 = smov 16   ;;  %s1563_s16 = smov 36  }
  0x1c   :  { %133 = vmatpush.bf16.msra.mxu2 %v1365_v6  ;;  %s1564_s0 = smov 28   ;;  %s1565_s17 = smov 32  }
  0x1d   :  { %196 = vmatpush.bf16.msra.mxu0 %v1369_v10  ;;  %1392 = vmatpush.bf16.msra.mxu1 %v1369_v10  ;;  %s1566_s9 = smov 48   ;;  %s1567_s11 = smov 40  }
  0x1e   :  { %s1568_s13 = smov 44  }
  0x1f   :  { %1270 = vmatmul.msk.bf16.vlgmr.msra.gmra.mxu2 %vm119_vm0, %v84_v11 }
  0x20   :  { %266 = vmatpush.bf16.msrb.mxu2 %v1376_v9  ;;  %1288 = vmatmul.msk.bf16.vlgmr.msra.gmra.mxu0 %vm119_vm0, %v84_v11 }
  0x21   :  { %1289 = vmatmul.msk.bf16.vlgmr.msra.gmra.mxu1 %vm119_vm0, %v85_v15 }
  0x24   :  { %267 = vmatpush.bf16.msrb.mxu2 %v1375_v14 }
  0x28   :  { %268 = vmatpush.bf16.msrb.mxu2 %v1374_v16 }
  0x2c   :  { %269 = vmatpush.bf16.msrb.mxu2 %v1373_v17 }
  0x2f   :  { %1271 = vmatmul.msk.bf16.gmra.mxu2 %vm119_vm0, %v85_v15 }
  0x3f   :  { %1306 = vmatmul.msk.bf16.vlgmr.msrb.gmra.mxu2 %vm119_vm0, %v84_v11 }
  0x4f   :  { %1307 = vmatmul.msk.bf16.gmra.mxu2 %vm119_vm0, %v85_v15 }
  0x9d   :  { %v198_v19 = vpop.f32.mrf.mxu0 }
  0x9e   :  { %v203_v25 = vpop.f32.mrf.mxu1 }
  0xa2   :  { %v135_v18 = vpop.f32.mrf.mxu2 }
  0xa3   :  { %145 = vst.msk [vmem:[#allocation2] sm:$0xff] %vm119_vm0, %v135_v18 }
  0xa5   :  { %v200_v24 = vpop.f32.mrf.mxu0 }
  0xa6   :  { %v205_v35 = vpop.f32.mrf.mxu1 }
  0xaa   :  { %v137_v20 = vpop.f32.mrf.mxu2  ;;  %v149_v21 = vld [vmem:[#allocation2] sm:$0xff] }
  0xab   :  { %146 = vst.msk [vmem:[#allocation2 + $0x8] sm:$0xff] %vm119_vm0, %v137_v20 }
  0xac   :  { %151 = vst.msk [vmem:[#allocation3 + $0x1] sm:$0xff] %vm119_vm0, %v149_v21 }
  0xad   :  { %208 = vst.msk [vmem:[#allocation2] sm:$0xff] %vm119_vm0, %v198_v19 }
  0xb2   :  { %v140_v22 = vpop.f32.mrf.mxu2  ;;  %v150_v23 = vld [vmem:[#allocation2 + $0x8] sm:$0xff] }
  0xb3   :  { %147 = vst.msk [vmem:[#allocation2 + $0x10] sm:$0xff] %vm119_vm0, %v140_v22 }
  0xb4   :  { %152 = vst.msk [vmem:[#allocation3 + $0x9] sm:$0xff] %vm119_vm0, %v150_v23  ;;  %v212_v27 = vld [vmem:[#allocation2] sm:$0xff] }
  0xb5   :  { %209 = vst.msk [vmem:[#allocation2 + $0x8] sm:$0xff] %vm119_vm0, %v200_v24 }
  0xba   :  { %v142_v28 = vpop.f32.mrf.mxu2  ;;  %v153_v29 = vld [vmem:[#allocation2 + $0x10] sm:$0xff] }
  0xbb   :  { %148 = vst.msk [vmem:[#allocation2 + $0x18] sm:$0xff] %vm119_vm0, %v142_v28  ;;  %v214_v30 = vld [vmem:[#allocation3 + $0x2] sm:$0xff]  ;;  %v215_v31 = vld [vmem:[#allocation3 + $0xa] sm:$0x7f] }
  0xbc   :  { %155 = vst.msk [vmem:[#allocation3 + $0x13] sm:$0xff] %vm119_vm0, %v153_v29  ;;  %v216_v32 = vadd.f32 %v214_v30, %v212_v27  ;;  %v213_v33 = vld [vmem:[#allocation2 + $0x8] sm:$0x7f] }
  0xbd   :  { %210 = vst.msk [vmem:[#allocation2 + $0x10] sm:$0xff] %vm119_vm0, %v203_v25  ;;  %v217_v34 = vadd.f32 %v215_v31, %v213_v33 }
  0xbe   :  { %218 = vst.msk [vmem:[#allocation3 + $0x2] sm:$0xff] %vm119_vm0, %v216_v32 }
  0xbf   :  { %220 = vst.msk [vmem:[#allocation3 + $0xa] sm:$0x7f] %vm219_vm2, %v217_v34 }
  0xc2   :  { %v154_v36 = vld [vmem:[#allocation2 + $0x18] sm:$0xff]  ;;  %v271_v37 = vpop.f32.mrf.mxu2 }
  0xc3   :  { %156 = vst.msk [vmem:[#allocation3 + $0x1b] sm:$0xff] %vm119_vm0, %v154_v36 }
  0xc4   :  { %211 = vst.msk [vmem:[#allocation2 + $0x18] sm:$0xff] %vm119_vm0, %v205_v35  ;;  %v221_v38 = vld [vmem:[#allocation2 + $0x10] sm:$0xff] }
  0xc5   :  { %281 = vst.msk [vmem:[#allocation2] sm:$0xff] %vm119_vm0, %v271_v37  ;;  %v287_v45 = vld [vmem:[#allocation3 + $0x1] sm:$0xff] }
  0xc6   :  { %v288_v48 = vld [vmem:[#allocation3 + $0x9] sm:$0x7f] }
  0xca   :  { %v273_v39 = vpop.f32.mrf.mxu2  ;;  %v223_v40 = vld [vmem:[#allocation3 + $0x14] sm:$0xff]  ;;  %v224_v41 = vld [vmem:[#allocation3 + $0x1c] sm:$0x7f] }
  0xcb   :  { %282 = vst.msk [vmem:[#allocation2 + $0x8] sm:$0xff] %vm119_vm0, %v273_v39  ;;  %v225_v42 = vadd.f32 %v223_v40, %v221_v38  ;;  %v222_v43 = vld [vmem:[#allocation2 + $0x18] sm:$0x7f] }
  0xcc   :  { %v226_v44 = vadd.f32 %v224_v41, %v222_v43 }
  0xcd   :  { %227 = vst.msk [vmem:[#allocation3 + $0x14] sm:$0xff] %vm119_vm0, %v225_v42 }
  0xce   :  { %228 = vst.msk [vmem:[#allocation3 + $0x1c] sm:$0x7f] %vm219_vm2, %v226_v44 }
  0xd2   :  { %v285_v46 = vld [vmem:[#allocation2 + $0x1] sm:$0xff]  ;;  %v286_v47 = vld [vmem:[#allocation2 + $0x9] sm:$0x7f]  ;;  %v276_v49 = vpop.f32.mrf.mxu2 }
  0xd3   :  { %v289_v50 = vadd.f32 %v287_v45, %v285_v46  ;;  %v290_v51 = vadd.f32 %v288_v48, %v286_v47  ;;  %283 = vst.msk [vmem:[#allocation2 + $0x10] sm:$0xff] %vm119_vm0, %v276_v49 }
  0xd4   :  { %v295_v53 = vld [vmem:[#allocation3 + $0x13] sm:$0xff] }
  0xd5   :  { %291 = vst.msk [vmem:[#allocation3 + $0x1] sm:$0xff] %vm119_vm0, %v289_v50  ;;  %v296_v56 = vld [vmem:[#allocation3 + $0x1b] sm:$0x7f] }
  0xd6   :  { %292 = vst.msk [vmem:[#allocation3 + $0x9] sm:$0x7f] %vm219_vm2, %v290_v51 }
  0xda   :  { %v278_v52 = vpop.f32.mrf.mxu2 }
  0xdb   :  { %284 = vst.msk [vmem:[#allocation2 + $0x18] sm:$0xff] %vm119_vm0, %v278_v52 }
  0xdc   :  { %v1663_v60 = vld [vmem:[#allocation3] sm:$0xff] }
  0xdd   :  { %v1660_v59 = vld [vmem:[#allocation3 + $0x8] sm:$0xff]  ;;  %v306_v62 = vsel %vm119_vm0, %v1663_v60, 0.0  ;;  %v322_v11 = vmul.f32 %v1663_v60, %v1663_v60 }
  0xde   :  { %v307_v61 = vsel %vm119_vm0, %v1660_v59, 0.0  ;;  %v323_v10 = vmul.f32 %v1660_v59, %v1660_v59 }
  0xdf   :  { %v308_v0 = vadd.f32 %v307_v61, %v306_v62  ;;  %v327_v16 = vsel %vm119_vm0, %v322_v11, 0.0 }
  0xe0   :  { %v328_v15 = vsel %vm119_vm0, %v323_v10, 0.0 }
  0xe1   :  { %v329_v20 = vadd.f32 %v328_v15, %v327_v16 }
  0xe2   :  { %v293_v54 = vld [vmem:[#allocation2 + $0x11] sm:$0xff]  ;;  %v294_v55 = vld [vmem:[#allocation2 + $0x19] sm:$0x7f] }
  0xe3   :  { %v297_v57 = vadd.f32 %v295_v53, %v293_v54  ;;  %v298_v58 = vadd.f32 %v296_v56, %v294_v55 }
  0xe5   :  { %299 = vst.msk [vmem:[#allocation3 + $0x13] sm:$0xff] %vm119_vm0, %v297_v57 }
  0xe6   :  { %300 = vst.msk [vmem:[#allocation3 + $0x1b] sm:$0x7f] %vm219_vm2, %v298_v58  ;;  %vm550_vm2 = vcmask 326656  }
  0xec   :  { %v1669_v63 = vld [vmem:[#allocation3 + $0x10] sm:$0xff] }
  0xed   :  { %v1671_v1 = vld [vmem:[#allocation3 + $0x18] sm:$0xff]  ;;  %v309_v2 = vsel %vm119_vm0, %v1669_v63, 0.0  ;;  %v1675_v3 = vld [vmem:[#allocation3 + $0x20] sm:$0xf]  ;;  %v324_v13 = vmul.f32 %v1669_v63, %v1669_v63 }
  0xee   :  { %v310_v4 = vadd.f32 %v309_v2, %v308_v0  ;;  %v311_v5 = vsel %vm119_vm0, %v1671_v1, 0.0  ;;  %v314_v7 = vsel %vm313_vm3, %v1675_v3, 0.0  ;;  %v325_v21 = vmul.f32 %v1671_v1, %v1671_v1 }
  0xef   :  { %v330_v18 = vsel %vm119_vm0, %v324_v13, 0.0  ;;  %v326_v24 = vmul.f32 %v1675_v3, %v1675_v3 }
  0xf0   :  { %v312_v6 = vadd.f32 %v311_v5, %v310_v4  ;;  %v331_v23 = vadd.f32 %v330_v18, %v329_v20  ;;  %v332_v25 = vsel %vm119_vm0, %v325_v21, 0.0 }
  0xf1   :  { %v334_v27 = vsel %vm313_vm3, %v326_v24, 0.0  ;;  %vm552_vm3 = vcmask 359424  }
  0xf2   :  { %v315_v8 = vadd.f32 %v314_v7, %v312_v6  ;;  %v333_v26 = vadd.f32 %v332_v25, %v331_v23 }
  0xf4   :  { %v316_v9 = vrot.slane %v315_v8, 4  ;;  %v335_v28 = vadd.f32 %v334_v27, %v333_v26 }
  0xf6   :  { %v317_v12 = vadd.f32 %v316_v9, %v315_v8  ;;  %v336_v29 = vrot.slane %v335_v28, 4 }
  0xf8   :  { %v318_v14 = vrot.slane %v317_v12, 2  ;;  %v337_v30 = vadd.f32 %v336_v29, %v335_v28 }
  0xfa   :  { %v319_v17 = vadd.f32 %v318_v14, %v317_v12  ;;  %v338_v31 = vrot.slane %v337_v30, 2 }
  0xfc   :  { %v320_v19 = vrot.slane %v319_v17, 1  ;;  %v339_v32 = vadd.f32 %v338_v31, %v337_v30 }
  0xfe   :  { %v1692_v22 = vadd.f32 %v320_v19, %v319_v17  ;;  %v340_v33 = vrot.slane %v339_v32, 1 }
 0x100   :  { %362 = vrot.lane.b32.xlu2 %v1692_v22, %s1544_s4  ;;  %354 = vrot.lane.b32.xlu1 %v1692_v22, %s1545_s18  ;;  %v341_v34 = vadd.f32 %v340_v33, %v339_v32 }
 0x101   :  { %345 = vrot.lane.b32.xlu0 %v1692_v22, %s1546_s19 }
 0x108   :  { %378 = vrot.lane.b32.xlu2 %v1692_v22, %s1547_s20  ;;  %386 = vrot.lane.b32.xlu1 %v1692_v22, %s1548_s21 }
 0x109   :  { %370 = vrot.lane.b32.xlu0 %v1692_v22, %s1549_s22 }
 0x110   :  { %402 = vrot.lane.b32.xlu2 %v1692_v22, %s1550_s23  ;;  %410 = vrot.lane.b32.xlu1 %v1692_v22, %s1551_s24 }
 0x111   :  { %394 = vrot.lane.b32.xlu0 %v1692_v22, %s1552_s25 }
 0x118   :  { %426 = vrot.lane.b32.xlu2 %v1692_v22, %s2014_s26  ;;  %434 = vrot.lane.b32.xlu1 %v1692_v22, %s1554_s27 }
 0x119   :  { %418 = vrot.lane.b32.xlu0 %v1692_v22, %s2012_s28 }
 0x120   :  { %450 = vrot.lane.b32.xlu2 %v1692_v22, %s2010_s29  ;;  %358 = vrot.lane.b32.xlu1 %v341_v34, %s1545_s18 }
 0x121   :  { %442 = vrot.lane.b32.xlu0 %v1692_v22, %s2008_s30 }
 0x128   :  { %366 = vrot.lane.b32.xlu2 %v341_v34, %s1544_s4  ;;  %374 = vrot.lane.b32.xlu1 %v341_v34, %s1549_s22 }
 0x129   :  { %350 = vrot.lane.b32.xlu0 %v341_v34, %s1546_s19 }
 0x130   :  { %390 = vrot.lane.b32.xlu2 %v341_v34, %s1548_s21  ;;  %398 = vrot.lane.b32.xlu1 %v341_v34, %s1552_s25 }
 0x131   :  { %382 = vrot.lane.b32.xlu0 %v341_v34, %s1547_s20 }
 0x138   :  { %414 = vrot.lane.b32.xlu2 %v341_v34, %s1551_s24  ;;  %422 = vrot.lane.b32.xlu1 %v341_v34, %s2012_s28  ;;  %s1570_s28 = smov 52  }
 0x139   :  { %406 = vrot.lane.b32.xlu0 %v341_v34, %s1550_s23 }
 0x140   :  { %438 = vrot.lane.b32.xlu2 %v341_v34, %s1554_s27  ;;  %446 = vrot.lane.b32.xlu1 %v341_v34, %s2008_s30  ;;  %s2023_s30 = smov 88  }
 0x141   :  { %430 = vrot.lane.b32.xlu0 %v341_v34, %s2014_s26  ;;  %s2020_s26 = smov 56  }
 0x148   :  { %462 = vrot.lane.b32.xlu2 %v341_v34, %s2006_s8  ;;  %458 = vrot.lane.b32.xlu1 %v1692_v22, %s2006_s8  ;;  %s2024_s8 = smov 72  }
 0x149   :  { %454 = vrot.lane.b32.xlu0 %v341_v34, %s2010_s29  ;;  %s1569_s29 = smov 60  }
 0x15a   :  { %v363_v35 = vpop.permute.xlu2 %362 }
 0x162   :  { %v379_v36 = vpop.permute.xlu2 %378 }
 0x16a   :  { %v403_v39 = vpop.permute.xlu2 %402 }
 0x172   :  { %v355_v37 = vpop.permute.xlu1 %354  ;;  %v427_v42 = vpop.permute.xlu2 %426 }
 0x173   :  { %v346_v38 = vpop.permute.xlu0 %345 }
 0x174   :  { %v348_v48 = vadd.f32 %v346_v38, %v1692_v22 }
 0x176   :  { %v357_v49 = vadd.f32 %v355_v37, %v348_v48 }
 0x178   :  { %v365_v52 = vadd.f32 %v363_v35, %v357_v49 }
 0x17a   :  { %v387_v40 = vpop.permute.xlu1 %386  ;;  %v451_v46 = vpop.permute.xlu2 %450 }
 0x17b   :  { %v371_v41 = vpop.permute.xlu0 %370 }
 0x17c   :  { %v373_v54 = vadd.f32 %v371_v41, %v365_v52 }
 0x17e   :  { %v381_v56 = vadd.f32 %v379_v36, %v373_v54 }
 0x180   :  { %v389_v62 = vadd.f32 %v387_v40, %v381_v56 }
 0x182   :  { %v411_v43 = vpop.permute.xlu1 %410  ;;  %v367_v53 = vpop.permute.xlu2 %366 }
 0x183   :  { %v395_v44 = vpop.permute.xlu0 %394 }
 0x184   :  { %v397_v4 = vadd.f32 %v395_v44, %v389_v62 }
 0x186   :  { %v405_v9 = vadd.f32 %v403_v39, %v397_v4 }
 0x188   :  { %v413_v11 = vadd.f32 %v411_v43, %v405_v9 }
 0x18a   :  { %v435_v45 = vpop.permute.xlu1 %434  ;;  %v391_v0 = vpop.permute.xlu2 %390 }
 0x18b   :  { %v419_v47 = vpop.permute.xlu0 %418 }
 0x18c   :  { %v421_v15 = vadd.f32 %v419_v47, %v413_v11 }
 0x18e   :  { %v429_v19 = vadd.f32 %v427_v42, %v421_v15 }
 0x190   :  { %v437_v22 = vadd.f32 %v435_v45, %v429_v19 }
 0x192   :  { %v359_v50 = vpop.permute.xlu1 %358  ;;  %v415_v12 = vpop.permute.xlu2 %414 }
 0x193   :  { %v443_v51 = vpop.permute.xlu0 %442 }
 0x194   :  { %v445_v26 = vadd.f32 %v443_v51, %v437_v22 }
 0x196   :  { %v453_v28 = vadd.f32 %v451_v46, %v445_v26  ;;  %v342_v46 = vld [vmem:[%s1999_s2] sm:$0x1]  ;;  %s1562_s2 = smov 20  }
 0x197   :  { %v1388_v26 = vld [vmem:[#allocation9 + $0x58] sm:$0xff] }
 0x198   :  { %855 = vmatpush.bf16.msrb.mxu1 %v1388_v26 }
 0x19a   :  { %v375_v55 = vpop.permute.xlu1 %374  ;;  %v439_v23 = vpop.permute.xlu2 %438 }
 0x19b   :  { %v351_v57 = vpop.permute.xlu0 %350 }
 0x19c   :  { %v353_v58 = vadd.f32 %v351_v57, %v341_v34 }
 0x19e   :  { %v361_v61 = vadd.f32 %v359_v50, %v353_v58 }
 0x1a0   :  { %v369_v2 = vadd.f32 %v367_v53, %v361_v61  ;;  %v343_v53 = vld [vmem:[%s2000_s3] sm:$0x1]  ;;  %s2022_s3 = smov 84  }
 0x1a2   :  { %v399_v5 = vpop.permute.xlu1 %398  ;;  %v377_v6 = vadd.f32 %v375_v55, %v369_v2  ;;  %v463_v34 = vpop.permute.xlu2 %462 }
 0x1a3   :  { %v383_v7 = vpop.permute.xlu0 %382 }
 0x1a4   :  { %v385_v8 = vadd.f32 %v383_v7, %v377_v6 }
 0x1a6   :  { %v393_v10 = vadd.f32 %v391_v0, %v385_v8 }
 0x1a8   :  { %v401_v14 = vadd.f32 %v399_v5, %v393_v10 }
 0x1aa   :  { %v423_v13 = vpop.permute.xlu1 %422 }
 0x1ab   :  { %v407_v16 = vpop.permute.xlu0 %406 }
 0x1ac   :  { %v409_v17 = vadd.f32 %v407_v16, %v401_v14 }
 0x1ae   :  { %v417_v18 = vadd.f32 %v415_v12, %v409_v17 }
 0x1b0   :  { %v425_v21 = vadd.f32 %v423_v13, %v417_v18 }
 0x1b2   :  { %v447_v20 = vpop.permute.xlu1 %446 }
 0x1b3   :  { %v431_v24 = vpop.permute.xlu0 %430 }
 0x1b4   :  { %v433_v25 = vadd.f32 %v431_v24, %v425_v21  ;;  %v1380_v24 = vld [vmem:[#allocation9 + $0x18] sm:$0xff] }
 0x1b5   :  { %703 = vmatpush.bf16.msra.mxu3 %v1380_v24 }
 0x1b6   :  { %v441_v27 = vadd.f32 %v439_v23, %v433_v25  ;;  %v1384_v25 = vld [vmem:[#allocation9 + $0x38] sm:$0xff] }
 0x1b7   :  { %766 = vmatpush.bf16.msrb.mxu0 %v1384_v25 }
 0x1b8   :  { %v449_v30 = vadd.f32 %v447_v20, %v441_v27 }
 0x1ba   :  { %v459_v29 = vpop.permute.xlu1 %458 }
 0x1bb   :  { %v461_v31 = vadd.f32 %v459_v29, %v453_v28  ;;  %v455_v32 = vpop.permute.xlu0 %454 }
 0x1bc   :  { %v457_v33 = vadd.f32 %v455_v32, %v449_v30  ;;  %v1379_v32 = vld [vmem:[#allocation9 + $0x10] sm:$0xff] }
 0x1bd   :  { %v466_v35 = vmul.f32 0.001953125, %v461_v31  ;;  %704 = vmatpush.bf16.msra.mxu3 %v1379_v32 }
 0x1be   :  { %v465_v36 = vadd.f32 %v463_v34, %v457_v33  ;;  %v1383_v33 = vld [vmem:[#allocation9 + $0x30] sm:$0xff] }
 0x1bf   :  { %v468_v37 = vmul.f32 %v466_v35, %v466_v35  ;;  %v1387_v34 = vld [vmem:[#allocation9 + $0x50] sm:$0xff]  ;;  %767 = vmatpush.bf16.msrb.mxu0 %v1383_v33 }
 0x1c0   :  { %v467_v38 = vmul.f32 0.001953125, %v465_v36  ;;  %856 = vmatpush.bf16.msrb.mxu1 %v1387_v34 }
 0x1c2   :  { %v469_v39 = vsub.f32 %v467_v38, %v468_v37  ;;  %v1378_v38 = vld [vmem:[#allocation9 + $0x8] sm:$0xff] }
 0x1c3   :  { %705 = vmatpush.bf16.msra.mxu3 %v1378_v38 }
 0x1c4   :  { %v470_v40 = vmax.f32 %v469_v39, 0.0  ;;  %v1382_v39 = vld [vmem:[#allocation9 + $0x28] sm:$0xff] }
 0x1c5   :  { %768 = vmatpush.bf16.msrb.mxu0 %v1382_v39 }
 0x1c6   :  { %v471_v41 = vadd.f32 1e-05, %v470_v40  ;;  %v1386_v40 = vld [vmem:[#allocation9 + $0x48] sm:$0xff] }
 0x1c7   :  { %857 = vmatpush.bf16.msrb.mxu1 %v1386_v40 }
 0x1c8   :  { %1430 = vrsqrt.f32 %v471_v41  ;;  %vm478_vm5 = vweird.f32 %v471_v41 }
 0x1ce   :  { %v1431_v42 = vpop.eup %1430 }
 0x1cf   :  { %v473_v43 = vmul.f32 %v1431_v42, %v471_v41  ;;  %vm479_vm4 = vweird.f32 %v1431_v42 }
 0x1d0   :  { %vm480_vm6 = vmor %vm478_vm5, %vm479_vm4  ;;  %vm554_vm4 = vcmask 392192   ;;  %vm2017_vm5 = vcmask 424960  }
 0x1d1   :  { %v474_v44 = vmul.f32 %v1431_v42, %v473_v43 }
 0x1d3   :  { %v475_v45 = vmul.f32 0.5, %v474_v44 }
 0x1d5   :  { %v476_v47 = vsub.f32 1.5, %v475_v45  ;;  %v1377_v45 = vld [vmem:[#allocation9] sm:$0xff] }
 0x1d6   :  { %706 = vmatpush.bf16.msra.mxu3 %v1377_v45 }
 0x1d7   :  { %v477_v48 = vmul.f32 %v1431_v42, %v476_v47  ;;  %v1381_v47 = vld [vmem:[#allocation9 + $0x20] sm:$0xff] }
 0x1d8   :  { %769 = vmatpush.bf16.msrb.mxu0 %v1381_v47 }
 0x1d9   :  { %v481_v49 = vsel %vm480_vm6, %v1431_v42, %v477_v48  ;;  %vm2018_vm6 = vcmask 457728  }
 0x1da   :  { %v1747_v50 = vmul.f32 %v481_v49, %v342_v46  ;;  %v1385_v49 = vld [vmem:[#allocation9 + $0x40] sm:$0xff] }
 0x1db   :  { %858 = vmatpush.bf16.msrb.mxu1 %v1385_v49 }
 0x1dc   :  { %v486_v51 = vperm.slane %v1747_v50, 0  ;;  %v483_v52 = vmul.f32 %v1747_v50, %v466_v35 }
 0x1de   :  { %493 = vrot.lane.b32.xlu2 %v486_v51, %s1559_s12  ;;  %490 = vrot.lane.b32.xlu1 %v486_v51, %s1541_s14  ;;  %v484_v54 = vsub.f32 %v343_v53, %v483_v52 }
 0x1df   :  { %487 = vrot.lane.b32.xlu0 %v486_v51, %s1538_s10 }
 0x1e0   :  { %v563_v55 = vperm.slane %v484_v54, 0 }
 0x1e6   :  { %502 = vrot.lane.b32.xlu2 %v486_v51, %s1560_s1  ;;  %496 = vrot.lane.b32.xlu1 %v486_v51, %s1561_s15 }
 0x1e7   :  { %499 = vrot.lane.b32.xlu0 %v486_v51, %s1562_s2 }
 0x1ee   :  { %511 = vrot.lane.b32.xlu2 %v486_v51, %s1563_s16  ;;  %505 = vrot.lane.b32.xlu1 %v486_v51, %s1564_s0 }
 0x1ef   :  { %508 = vrot.lane.b32.xlu0 %v486_v51, %s1565_s17 }
 0x1f6   :  { %520 = vrot.lane.b32.xlu2 %v486_v51, %s1566_s9  ;;  %514 = vrot.lane.b32.xlu1 %v486_v51, %s1567_s11 }
 0x1f7   :  { %517 = vrot.lane.b32.xlu0 %v486_v51, %s1568_s13 }
 0x1fe   :  { %529 = vrot.lane.b32.xlu2 %v486_v51, %s1569_s29  ;;  %523 = vrot.lane.b32.xlu1 %v486_v51, %s1570_s28 }
 0x1ff   :  { %526 = vrot.lane.b32.xlu0 %v486_v51, %s2020_s26 }
 0x206   :  { %570 = vrot.lane.b32.xlu1 %v563_v55, %s1559_s12  ;;  %567 = vrot.lane.b32.xlu2 %v563_v55, %s1541_s14 }
 0x207   :  { %564 = vrot.lane.b32.xlu0 %v563_v55, %s1538_s10 }
 0x20e   :  { %579 = vrot.lane.b32.xlu1 %v563_v55, %s1560_s1  ;;  %576 = vrot.lane.b32.xlu2 %v563_v55, %s1562_s2 }
 0x20f   :  { %573 = vrot.lane.b32.xlu0 %v563_v55, %s1561_s15 }
 0x216   :  { %588 = vrot.lane.b32.xlu1 %v563_v55, %s1563_s16  ;;  %585 = vrot.lane.b32.xlu2 %v563_v55, %s1565_s17 }
 0x217   :  { %582 = vrot.lane.b32.xlu0 %v563_v55, %s1564_s0 }
 0x21e   :  { %597 = vrot.lane.b32.xlu1 %v563_v55, %s1566_s9  ;;  %594 = vrot.lane.b32.xlu2 %v563_v55, %s1568_s13 }
 0x21f   :  { %591 = vrot.lane.b32.xlu0 %v563_v55, %s1567_s11 }
 0x226   :  { %603 = vrot.lane.b32.xlu1 %v563_v55, %s2020_s26  ;;  %606 = vrot.lane.b32.xlu2 %v563_v55, %s1569_s29  ;;  %s2025_s26 = smov 76  }
 0x227   :  { %600 = vrot.lane.b32.xlu0 %v563_v55, %s1570_s28 }
 0x238   :  { %v494_v56 = vpop.permute.xlu2 %493 }
 0x240   :  { %v503_v57 = vpop.permute.xlu2 %502 }
 0x248   :  { %v512_v62 = vpop.permute.xlu2 %511 }
 0x250   :  { %v491_v58 = vpop.permute.xlu1 %490  ;;  %v1784_v4 = vpop.permute.xlu2 %520 }
 0x251   :  { %v488_v61 = vpop.permute.xlu0 %487 }
 0x252   :  { %v533_v12 = vsel %vm532_vm7, %v1747_v50, %v488_v61 }
 0x253   :  { %v535_v14 = vsel %vm534_vm8, %v533_v12, %v491_v58 }
 0x254   :  { %v537_v16 = vsel %vm536_vm9, %v535_v14, %v494_v56 }
 0x258   :  { %v497_v0 = vpop.permute.xlu1 %496  ;;  %v1786_v8 = vpop.permute.xlu2 %529 }
 0x259   :  { %v500_v2 = vpop.permute.xlu0 %499  ;;  %v539_v18 = vsel %vm538_vm10, %v537_v16, %v497_v0 }
 0x25a   :  { %v541_v19 = vsel %vm540_vm11, %v539_v18, %v500_v2 }
 0x25b   :  { %v543_v22 = vsel %vm2016_vm12, %v541_v19, %v503_v57 }
 0x260   :  { %v506_v5 = vpop.permute.xlu1 %505  ;;  %v568_v13 = vpop.permute.xlu2 %567 }
 0x261   :  { %v509_v6 = vpop.permute.xlu0 %508  ;;  %v545_v27 = vsel %vm544_vm13, %v543_v22, %v506_v5 }
 0x262   :  { %v547_v30 = vsel %vm546_vm14, %v545_v27, %v509_v6 }
 0x263   :  { %v549_v36 = vsel %vm548_vm15, %v547_v30, %v512_v62 }
 0x268   :  { %v515_v7 = vpop.permute.xlu1 %514  ;;  %v577_v20 = vpop.permute.xlu2 %576 }
 0x269   :  { %v518_v9 = vpop.permute.xlu0 %517  ;;  %v551_v41 = vsel %vm550_vm2, %v549_v36, %v515_v7 }
 0x26a   :  { %v553_v46 = vsel %vm552_vm3, %v551_v41, %v518_v9 }
 0x26b   :  { %v555_v51 = vsel %vm554_vm4, %v553_v46, %v1784_v4 }
 0x270   :  { %v1788_v10 = vpop.permute.xlu1 %523  ;;  %v586_v37 = vpop.permute.xlu2 %585 }
 0x271   :  { %v1790_v11 = vpop.permute.xlu0 %526  ;;  %v557_v52 = vsel %vm2017_vm5, %v555_v51, %v1788_v10 }
 0x272   :  { %v559_v57 = vsel %vm2018_vm6, %v557_v52, %v1790_v11 }
 0x278   :  { %v571_v15 = vpop.permute.xlu1 %570  ;;  %v595_v55 = vpop.permute.xlu2 %594 }
 0x279   :  { %v565_v17 = vpop.permute.xlu0 %564 }
 0x27a   :  { %v609_v21 = vsel %vm532_vm7, %v484_v54, %v565_v17 }
 0x27b   :  { %v610_v28 = vsel %vm534_vm8, %v609_v21, %v568_v13 }
 0x27c   :  { %v611_v31 = vsel %vm536_vm9, %v610_v28, %v571_v15 }
 0x280   :  { %v580_v23 = vpop.permute.xlu1 %579  ;;  %v607_v9 = vpop.permute.xlu2 %606 }
 0x281   :  { %v574_v29 = vpop.permute.xlu0 %573 }
 0x282   :  { %v612_v35 = vsel %vm538_vm10, %v611_v31, %v574_v29 }
 0x283   :  { %v613_v42 = vsel %vm540_vm11, %v612_v35, %v577_v20 }
 0x284   :  { %v614_v48 = vsel %vm2016_vm12, %v613_v42, %v580_v23  ;;  %vm2019_vm12 = vcmask 490496  }
 0x285   :  { %v561_v62 = vsel %vm2019_vm12, %v559_v57, %v1786_v8 }
 0x286   :  { %v624_v2 = vperm.slane %v561_v62, 0 }
 0x288   :  { %v589_v43 = vpop.permute.xlu1 %588  ;;  %v626_v11 = vmul.f32 %v624_v2, %v1663_v60  ;;  %v627_v13 = vmul.f32 %v624_v2, %v1660_v59  ;;  %v628_v8 = vmul.f32 %v624_v2, %v1669_v63  ;;  %v639_v14 = vmul.f32 %v624_v2, %v1671_v1 }
 0x289   :  { %v583_v44 = vpop.permute.xlu0 %582  ;;  %v640_v16 = vmul.f32 %v624_v2, %v1675_v3 }
 0x28a   :  { %v615_v50 = vsel %vm544_vm13, %v614_v48, %v583_v44 }
 0x28b   :  { %v616_v53 = vsel %vm546_vm14, %v615_v50, %v586_v37 }
 0x28c   :  { %v617_v58 = vsel %vm548_vm15, %v616_v53, %v589_v43 }
 0x290   :  { %v598_v54 = vpop.permute.xlu1 %597 }
 0x291   :  { %v592_v56 = vpop.permute.xlu0 %591 }
 0x292   :  { %v618_v61 = vsel %vm550_vm2, %v617_v58, %v592_v56 }
 0x293   :  { %v619_v0 = vsel %vm552_vm3, %v618_v61, %v595_v55 }
 0x294   :  { %v620_v5 = vsel %vm554_vm4, %v619_v0, %v598_v54 }
 0x298   :  { %v604_v4 = vpop.permute.xlu1 %603 }
 0x299   :  { %v601_v6 = vpop.permute.xlu0 %600 }
 0x29a   :  { %v621_v7 = vsel %vm2017_vm5, %v620_v5, %v601_v6  ;;  %vm635_vm5 = vcmask 523265  }
 0x29b   :  { %v622_v10 = vsel %vm2018_vm6, %v621_v7, %v604_v4  ;;  %vm645_vm6 = vcmask 523267  }
 0x29c   :  { %v623_v12 = vsel %vm2019_vm12, %v622_v10, %v607_v9  ;;  %vm648_vm12 = vcmask 518144  }
 0x29d   :  { %v625_v15 = vperm.slane %v623_v12, 0 }
 0x29f   :  { %v629_v17 = vadd.f32 %v626_v11, %v625_v15  ;;  %v630_v18 = vadd.f32 %v627_v13, %v625_v15  ;;  %v631_v19 = vadd.f32 %v628_v8, %v625_v15  ;;  %v641_v20 = vadd.f32 %v639_v14, %v625_v15 }
 0x2a0   :  { %v642_v21 = vadd.f32 %v640_v16, %v625_v15 }
 0x2a1   :  { %v632_v22 = vmax.f32 %v629_v17, 0.0  ;;  %v633_v60 = vmax.f32 %v630_v18, 0.0  ;;  %v634_v23 = vmax.f32 %v631_v19, 0.0  ;;  %v643_v24 = vmax.f32 %v641_v20, 0.0 }
 0x2a2   :  { %v644_v59 = vmax.f32 %v642_v21, 0.0 }
 0x2a3   :  { %636 = vst.msk [vmem:[#allocation3] sm:$0xfe] %vm635_vm5, %v632_v22  ;;  %vm879_vm5 = vcmask 1045504  }
 0x2a4   :  { %646 = vst.msk [vmem:[#allocation3 + $0x10] sm:$0xf8] %vm645_vm6, %v634_v23  ;;  %vm806_vm6 = vcmask 1044480  }
 0x2a5   :  { %637 = vst.msk [vmem:[#allocation3 + $0x8] sm:$0xff] %vm119_vm0, %v633_v60 }
 0x2a6   :  { %638 = vst.msk [vmem:[#allocation3 + $0x10] sm:$0x1] %vm75_vm1, %v634_v23  ;;  %vm790_vm1 = vcmask 1046528  }
 0x2a7   :  { %647 = vst.msk [vmem:[#allocation3 + $0x18] sm:$0xff] %vm119_vm0, %v643_v24 }
 0x2a8   :  { %649 = vst.msk [vmem:[#allocation3 + $0x20] sm:$0x7] %vm648_vm12, %v644_v59  ;;  %vm724_vm12 = vcmask 523266  }
 0x2aa   :  { %v650_v63 = vld [vmem:[#allocation3] sm:$0xff] }
 0x2ac   :  { %v651_v1 = vld [vmem:[#allocation3 + $0x8] sm:$0xff] }
 0x2ad   :  { %v655_v3 = vpack.c.bf16 %v651_v1, %v650_v63  ;;  %v652_v25 = vld [vmem:[#allocation3 + $0x10] sm:$0xff] }
 0x2ae   :  { %v653_v26 = vld [vmem:[#allocation3 + $0x18] sm:$0xff] }
 0x2af   :  { %1324 = vmatmul.msk.bf16.vlgmr.msra.gmra.mxu3 %vm119_vm0, %v655_v3  ;;  %1343 = vmatmul.msk.bf16.vlgmr.msrb.gmra.mxu0 %vm119_vm0, %v655_v3  ;;  %v656_v27 = vpack.c.bf16 %v653_v26, %v652_v25  ;;  %v654_v28 = vld [vmem:[#allocation3 + $0x20] sm:$0xf] }
 0x2b0   :  { %1362 = vmatmul.msk.bf16.vlgmr.msrb.gmra.mxu1 %vm119_vm0, %v655_v3  ;;  %v657_v29 = vpack.c.bf16 %v654_v28, %v654_v28 }
 0x2bf   :  { %1325 = vmatmul.msk.bf16.gmra.mxu3 %vm119_vm0, %v656_v27  ;;  %1344 = vmatmul.msk.bf16.gmra.mxu0 %vm119_vm0, %v656_v27 }
 0x2c0   :  { %1363 = vmatmul.msk.bf16.gmra.mxu1 %vm119_vm0, %v656_v27 }
 0x2cf   :  { %1326 = vmatmul.msk.bf16.gmra.mxu3 %vm119_vm0, %v657_v29  ;;  %1345 = vmatmul.msk.bf16.gmra.mxu0 %vm119_vm0, %v657_v29 }
 0x2d0   :  { %1364 = vmatmul.msk.bf16.gmra.mxu1 %vm119_vm0, %v657_v29 }
 0x32c   :  { %v771_v30 = vpop.f32.mrf.mxu0 }
 0x32d   :  { %v860_v31 = vpop.f32.mrf.mxu1  ;;  %v791_v36 = vrot.slane %v771_v30, 1 }
 0x32e   :  { %v880_v45 = vrot.slane %v860_v31, 2 }
 0x332   :  { %v708_v32 = vpop.f32.mrf.mxu3 }
 0x333   :  { %722 = vst.msk [vmem:[#allocation10] sm:$0xff] %vm119_vm0, %v708_v32 }
 0x334   :  { %v773_v33 = vpop.f32.mrf.mxu0 }
 0x335   :  { %v862_v34 = vpop.f32.mrf.mxu1  ;;  %v792_v35 = vrot.slane %v773_v33, 1 }
 0x336   :  { %v881_v44 = vrot.slane %v862_v34, 2 }
 0x337   :  { %v793_v38 = vsel %vm790_vm1, %v791_v36, %v792_v35 }
 0x338   :  { %v882_v51 = vsel %vm879_vm5, %v880_v45, %v881_v44 }
 0x33a   :  { %v785_v37 = vld [vmem:[#allocation10] sm:$0xff]  ;;  %v710_v39 = vpop.f32.mrf.mxu3 }
 0x33b   :  { %v798_v40 = vadd.f32 %v793_v38, %v785_v37  ;;  %723 = vst.msk [vmem:[#allocation10 + $0x8] sm:$0xff] %vm119_vm0, %v710_v39 }
 0x33c   :  { %v776_v41 = vpop.f32.mrf.mxu0 }
 0x33d   :  { %800 = vst.msk [vmem:[#allocation10] sm:$0xff] %vm119_vm0, %v798_v40  ;;  %v865_v42 = vpop.f32.mrf.mxu1  ;;  %v794_v43 = vrot.slane %v776_v41, 1  ;;  %v807_v4 = vrot.slane %v776_v41, 3 }
 0x33e   :  { %v883_v55 = vrot.slane %v865_v42, 2  ;;  %v896_v8 = vrot.slane %v865_v42, 4 }
 0x33f   :  { %v795_v46 = vsel %vm790_vm1, %v792_v35, %v794_v43  ;;  %vm727_vm1 = vcmask 517120  }
 0x340   :  { %v884_v58 = vsel %vm879_vm5, %v881_v44, %v883_v55 }
 0x342   :  { %v786_v47 = vld [vmem:[#allocation10 + $0x8] sm:$0xff]  ;;  %v713_v48 = vpop.f32.mrf.mxu3 }
 0x343   :  { %v799_v49 = vadd.f32 %v795_v46, %v786_v47  ;;  %725 = vst.msk [vmem:[#allocation10 + $0xe] sm:$0xfc] %vm724_vm12, %v713_v48  ;;  %vm895_vm12 = vcmask 1043456  }
 0x344   :  { %v874_v50 = vld [vmem:[#allocation10] sm:$0xff]  ;;  %v778_v52 = vpop.f32.mrf.mxu0 }
 0x345   :  { %v887_v53 = vadd.f32 %v882_v51, %v874_v50  ;;  %801 = vst.msk [vmem:[#allocation10 + $0x8] sm:$0xff] %vm119_vm0, %v799_v49  ;;  %v867_v54 = vpop.f32.mrf.mxu1  ;;  %v808_v2 = vrot.slane %v778_v52, 3 }
 0x346   :  { %v897_v13 = vrot.slane %v867_v54, 4 }
 0x347   :  { %889 = vst.msk [vmem:[#allocation10] sm:$0xff] %vm119_vm0, %v887_v53  ;;  %v809_v5 = vsel %vm806_vm6, %v807_v4, %v808_v2 }
 0x348   :  { %v898_v18 = vsel %vm895_vm12, %v896_v8, %v897_v13 }
 0x34a   :  { %v715_v56 = vpop.f32.mrf.mxu3 }
 0x34b   :  { %726 = vst.msk [vmem:[#allocation10 + $0x16] sm:$0xff] %vm119_vm0, %v715_v56 }
 0x34c   :  { %v875_v57 = vld [vmem:[#allocation10 + $0x8] sm:$0xff]  ;;  %v781_v61 = vpop.f32.mrf.mxu0 }
 0x34d   :  { %v888_v62 = vadd.f32 %v884_v58, %v875_v57  ;;  %v870_v0 = vpop.f32.mrf.mxu1  ;;  %v810_v12 = vrot.slane %v781_v61, 3 }
 0x34e   :  { %v899_v21 = vrot.slane %v870_v0, 4  ;;  %v1861_v59 = vld [vmem:[#allocation10] sm:$0xff] }
 0x34f   :  { %890 = vst.msk [vmem:[#allocation10 + $0x8] sm:$0xff] %vm119_vm0, %v888_v62  ;;  %v811_v14 = vsel %vm806_vm6, %v808_v2, %v810_v12  ;;  %v911_v3 = vsel %vm119_vm0, %v1861_v59, 0.0  ;;  %v924_v37 = vmul.f32 %v1861_v59, %v1861_v59 }
 0x350   :  { %v900_v22 = vsel %vm895_vm12, %v897_v13, %v899_v21  ;;  %vm2028_vm12 = vcmask 195584  }
 0x351   :  { %v928_v42 = vsel %vm119_vm0, %v924_v37, 0.0 }
 0x352   :  { %v802_v6 = vld [vmem:[#allocation10 + $0x10] sm:$0xff]  ;;  %v718_v7 = vpop.f32.mrf.mxu3 }
 0x353   :  { %v814_v9 = vadd.f32 %v809_v5, %v802_v6  ;;  %728 = vst.msk [vmem:[#allocation10 + $0x1e] sm:$0x3] %vm727_vm1, %v718_v7 }
 0x354   :  { %v783_v10 = vpop.f32.mrf.mxu0 }
 0x355   :  { %816 = vst.msk [vmem:[#allocation10 + $0x10] sm:$0xff] %vm119_vm0, %v814_v9  ;;  %v872_v11 = vpop.f32.mrf.mxu1 }
 0x356   :  { %v1858_v24 = vld [vmem:[#allocation10 + $0x8] sm:$0xff] }
 0x357   :  { %v912_v1 = vsel %vm119_vm0, %v1858_v24, 0.0  ;;  %v925_v35 = vmul.f32 %v1858_v24, %v1858_v24 }
 0x358   :  { %v913_v26 = vadd.f32 %v912_v1, %v911_v3 }
 0x359   :  { %v929_v40 = vsel %vm119_vm0, %v925_v35, 0.0 }
 0x35a   :  { %v803_v15 = vld [vmem:[#allocation10 + $0x18] sm:$0xff]  ;;  %v720_v16 = vpop.f32.mrf.mxu3  ;;  %v930_v44 = vadd.f32 %v929_v40, %v928_v42 }
 0x35b   :  { %v815_v17 = vadd.f32 %v811_v14, %v803_v15 }
 0x35c   :  { %v891_v19 = vld [vmem:[#allocation10 + $0x10] sm:$0xff] }
 0x35d   :  { %v903_v20 = vadd.f32 %v898_v18, %v891_v19  ;;  %817 = vst.msk [vmem:[#allocation10 + $0x18] sm:$0xff] %vm119_vm0, %v815_v17 }
 0x35f   :  { %905 = vst.msk [vmem:[#allocation10 + $0x10] sm:$0xff] %vm119_vm0, %v903_v20 }
 0x364   :  { %v892_v60 = vld [vmem:[#allocation10 + $0x18] sm:$0xff] }
 0x365   :  { %v904_v23 = vadd.f32 %v900_v22, %v892_v60 }
 0x366   :  { %v1863_v63 = vld [vmem:[#allocation10 + $0x10] sm:$0xff] }
 0x367   :  { %906 = vst.msk [vmem:[#allocation10 + $0x18] sm:$0xff] %vm119_vm0, %v904_v23  ;;  %v914_v25 = vsel %vm119_vm0, %v1863_v63, 0.0  ;;  %v926_v38 = vmul.f32 %v1863_v63, %v1863_v63 }
 0x368   :  { %v915_v27 = vadd.f32 %v914_v25, %v913_v26 }
 0x369   :  { %v931_v43 = vsel %vm119_vm0, %v926_v38, 0.0 }
 0x36a   :  { %v932_v47 = vadd.f32 %v931_v43, %v930_v44 }
 0x36e   :  { %v1871_v28 = vld [vmem:[#allocation10 + $0x18] sm:$0xff] }
 0x36f   :  { %v916_v29 = vsel %vm119_vm0, %v1871_v28, 0.0  ;;  %v927_v41 = vmul.f32 %v1871_v28, %v1871_v28 }
 0x370   :  { %v917_v30 = vadd.f32 %v916_v29, %v915_v27 }
 0x371   :  { %v933_v45 = vsel %vm119_vm0, %v927_v41, 0.0 }
 0x372   :  { %v918_v31 = vrot.slane %v917_v30, 4  ;;  %v934_v46 = vadd.f32 %v933_v45, %v932_v47 }
 0x374   :  { %v919_v32 = vadd.f32 %v918_v31, %v917_v30  ;;  %v935_v48 = vrot.slane %v934_v46, 4 }
 0x376   :  { %v920_v33 = vrot.slane %v919_v32, 2  ;;  %v936_v49 = vadd.f32 %v935_v48, %v934_v46 }
 0x378   :  { %v921_v34 = vadd.f32 %v920_v33, %v919_v32  ;;  %v937_v50 = vrot.slane %v936_v49, 2 }
 0x37a   :  { %v922_v36 = vrot.slane %v921_v34, 1  ;;  %v938_v51 = vadd.f32 %v937_v50, %v936_v49 }
 0x37c   :  { %v923_v39 = vadd.f32 %v922_v36, %v921_v34  ;;  %v939_v52 = vrot.slane %v938_v51, 1 }
 0x37e   :  { %961 = vrot.lane.b32.xlu1 %v923_v39, %s1544_s4  ;;  %953 = vrot.lane.b32.xlu2 %v923_v39, %s1545_s18  ;;  %v940_v53 = vadd.f32 %v939_v52, %v938_v51 }
 0x37f   :  { %944 = vrot.lane.b32.xlu0 %v923_v39, %s1546_s19 }
 0x386   :  { %985 = vrot.lane.b32.xlu1 %v923_v39, %s1548_s21  ;;  %977 = vrot.lane.b32.xlu2 %v923_v39, %s1547_s20 }
 0x387   :  { %969 = vrot.lane.b32.xlu0 %v923_v39, %s1549_s22 }
 0x38e   :  { %1009 = vrot.lane.b32.xlu1 %v923_v39, %s1551_s24  ;;  %1001 = vrot.lane.b32.xlu2 %v923_v39, %s1550_s23 }
 0x38f   :  { %993 = vrot.lane.b32.xlu0 %v923_v39, %s1552_s25 }
 0x396   :  { %1033 = vrot.lane.b32.xlu1 %v923_v39, %s1554_s27  ;;  %1025 = vrot.lane.b32.xlu2 %v923_v39, %s2022_s3 }
 0x397   :  { %1017 = vrot.lane.b32.xlu0 %v923_v39, %s2023_s30 }
 0x39e   :  { %949 = vrot.lane.b32.xlu1 %v940_v53, %s1546_s19  ;;  %1049 = vrot.lane.b32.xlu2 %v923_v39, %s2024_s8 }
 0x39f   :  { %1041 = vrot.lane.b32.xlu0 %v923_v39, %s2025_s26 }
 0x3a6   :  { %973 = vrot.lane.b32.xlu1 %v940_v53, %s1549_s22  ;;  %965 = vrot.lane.b32.xlu2 %v940_v53, %s1544_s4  ;;  %s2026_s4 = smov 68  }
 0x3a7   :  { %957 = vrot.lane.b32.xlu0 %v940_v53, %s1545_s18 }
 0x3ae   :  { %997 = vrot.lane.b32.xlu1 %v940_v53, %s1552_s25  ;;  %989 = vrot.lane.b32.xlu2 %v940_v53, %s1548_s21  ;;  %s2027_s21 = smov 56  }
 0x3af   :  { %981 = vrot.lane.b32.xlu0 %v940_v53, %s1547_s20 }
 0x3b6   :  { %1021 = vrot.lane.b32.xlu1 %v940_v53, %s2023_s30  ;;  %1013 = vrot.lane.b32.xlu2 %v940_v53, %s1551_s24  ;;  %s2036_s24 = smov 128  }
 0x3b7   :  { %1005 = vrot.lane.b32.xlu0 %v940_v53, %s1550_s23  ;;  %s1240_s23 = sshll.u32 %s2004_s7, 4  ;;  %s1241_s23 = int_to_ptr.hbm [resolvable:$true] %s1240_s23 }
 0x3be   :  { %1045 = vrot.lane.b32.xlu1 %v940_v53, %s2025_s26  ;;  %1037 = vrot.lane.b32.xlu2 %v940_v53, %s1554_s27 }
 0x3bf   :  { %1029 = vrot.lane.b32.xlu0 %v940_v53, %s2022_s3 }
 0x3c6   :  { %1057 = vrot.lane.b32.xlu1 %v923_v39, %s2026_s4  ;;  %1061 = vrot.lane.b32.xlu2 %v940_v53, %s2026_s4 }
 0x3c7   :  { %1053 = vrot.lane.b32.xlu0 %v940_v53, %s2024_s8 }
 0x3d8   :  { %v954_v54 = vpop.permute.xlu2 %953 }
 0x3e0   :  { %v978_v55 = vpop.permute.xlu2 %977 }
 0x3e8   :  { %v1002_v58 = vpop.permute.xlu2 %1001 }
 0x3f0   :  { %v962_v56 = vpop.permute.xlu1 %961  ;;  %v1026_v0 = vpop.permute.xlu2 %1025 }
 0x3f1   :  { %v945_v57 = vpop.permute.xlu0 %944 }
 0x3f2   :  { %v947_v9 = vadd.f32 %v945_v57, %v923_v39 }
 0x3f4   :  { %v956_v10 = vadd.f32 %v954_v54, %v947_v9 }
 0x3f6   :  { %v964_v13 = vadd.f32 %v962_v56, %v956_v10 }
 0x3f8   :  { %v986_v61 = vpop.permute.xlu1 %985  ;;  %v1050_v6 = vpop.permute.xlu2 %1049 }
 0x3f9   :  { %v970_v62 = vpop.permute.xlu0 %969 }
 0x3fa   :  { %v972_v14 = vadd.f32 %v970_v62, %v964_v13  ;;  %v942_v13 = vld [vmem:[%s2003_s6] sm:$0x1]  ;;  %s1572_s6 = smov [#allocation10]  }
 0x3fc   :  { %v980_v17 = vadd.f32 %v978_v55, %v972_v14 }
 0x3fe   :  { %v988_v21 = vadd.f32 %v986_v61, %v980_v17 }
 0x400   :  { %v1010_v2 = vpop.permute.xlu1 %1009  ;;  %v966_v8 = vpop.permute.xlu2 %965 }
 0x401   :  { %v994_v4 = vpop.permute.xlu0 %993 }
 0x402   :  { %v996_v60 = vadd.f32 %v994_v4, %v988_v21 }
 0x404   :  { %v1004_v26 = vadd.f32 %v1002_v58, %v996_v60 }
 0x406   :  { %v1012_v29 = vadd.f32 %v1010_v2, %v1004_v26 }
 0x408   :  { %v1034_v5 = vpop.permute.xlu1 %1033  ;;  %v990_v22 = vpop.permute.xlu2 %989 }
 0x409   :  { %v1018_v7 = vpop.permute.xlu0 %1017 }
 0x40a   :  { %v1020_v33 = vadd.f32 %v1018_v7, %v1012_v29 }
 0x40c   :  { %v1028_v37 = vadd.f32 %v1026_v0, %v1020_v33 }
 0x40e   :  { %v1036_v40 = vadd.f32 %v1034_v5, %v1028_v37 }
 0x410   :  { %v950_v11 = vpop.permute.xlu1 %949  ;;  %v1014_v30 = vpop.permute.xlu2 %1013 }
 0x411   :  { %v1042_v12 = vpop.permute.xlu0 %1041  ;;  %v952_v15 = vadd.f32 %v950_v11, %v940_v53 }
 0x412   :  { %v1044_v44 = vadd.f32 %v1042_v12, %v1036_v40 }
 0x414   :  { %v1052_v47 = vadd.f32 %v1050_v6, %v1044_v44  ;;  %v941_v6 = vld [vmem:[%s2002_s5] sm:$0x1] }
 0x418   :  { %v974_v16 = vpop.permute.xlu1 %973  ;;  %v1038_v41 = vpop.permute.xlu2 %1037 }
 0x419   :  { %v958_v18 = vpop.permute.xlu0 %957 }
 0x41a   :  { %v960_v19 = vadd.f32 %v958_v18, %v952_v15 }
 0x41c   :  { %v968_v20 = vadd.f32 %v966_v8, %v960_v19 }
 0x41e   :  { %v976_v1 = vadd.f32 %v974_v16, %v968_v20 }
 0x420   :  { %v998_v23 = vpop.permute.xlu1 %997  ;;  %v1062_v52 = vpop.permute.xlu2 %1061 }
 0x421   :  { %v982_v3 = vpop.permute.xlu0 %981 }
 0x422   :  { %v984_v25 = vadd.f32 %v982_v3, %v976_v1 }
 0x424   :  { %v992_v27 = vadd.f32 %v990_v22, %v984_v25 }
 0x426   :  { %v1000_v32 = vadd.f32 %v998_v23, %v992_v27 }
 0x428   :  { %v1022_v31 = vpop.permute.xlu1 %1021 }
 0x429   :  { %v1006_v34 = vpop.permute.xlu0 %1005 }
 0x42a   :  { %v1008_v35 = vadd.f32 %v1006_v34, %v1000_v32 }
 0x42c   :  { %v1016_v36 = vadd.f32 %v1014_v30, %v1008_v35 }
 0x42e   :  { %v1024_v39 = vadd.f32 %v1022_v31, %v1016_v36 }
 0x430   :  { %v1046_v38 = vpop.permute.xlu1 %1045 }
 0x431   :  { %v1030_v42 = vpop.permute.xlu0 %1029 }
 0x432   :  { %v1032_v43 = vadd.f32 %v1030_v42, %v1024_v39 }
 0x434   :  { %v1040_v45 = vadd.f32 %v1038_v41, %v1032_v43 }
 0x436   :  { %v1048_v48 = vadd.f32 %v1046_v38, %v1040_v45 }
 0x438   :  { %v1058_v46 = vpop.permute.xlu1 %1057 }
 0x439   :  { %v1060_v49 = vadd.f32 %v1058_v46, %v1052_v47  ;;  %v1054_v50 = vpop.permute.xlu0 %1053 }
 0x43a   :  { %v1056_v51 = vadd.f32 %v1054_v50, %v1048_v48 }
 0x43b   :  { %v1065_v53 = vmul.f32 0.001953125, %v1060_v49 }
 0x43c   :  { %v1064_v54 = vadd.f32 %v1062_v52, %v1056_v51 }
 0x43d   :  { %v1067_v55 = vmul.f32 %v1065_v53, %v1065_v53 }
 0x43e   :  { %v1066_v56 = vmul.f32 0.001953125, %v1064_v54 }
 0x440   :  { %v1068_v57 = vsub.f32 %v1066_v56, %v1067_v55 }
 0x442   :  { %v1069_v58 = vmax.f32 %v1068_v57, 0.0 }
 0x444   :  { %v1070_v61 = vadd.f32 1e-05, %v1069_v58 }
 0x446   :  { %1432 = vrsqrt.f32 %v1070_v61  ;;  %vm1077_vm6 = vweird.f32 %v1070_v61 }
 0x44c   :  { %v1433_v62 = vpop.eup %1432 }
 0x44d   :  { %v1072_v0 = vmul.f32 %v1433_v62, %v1070_v61  ;;  %vm1078_vm5 = vweird.f32 %v1433_v62 }
 0x44e   :  { %vm1079_vm1 = vmor %vm1077_vm6, %vm1078_vm5 }
 0x44f   :  { %v1073_v2 = vmul.f32 %v1433_v62, %v1072_v0 }
 0x451   :  { %v1074_v4 = vmul.f32 0.5, %v1073_v2 }
 0x453   :  { %v1075_v5 = vsub.f32 1.5, %v1074_v4 }
 0x455   :  { %v1076_v7 = vmul.f32 %v1433_v62, %v1075_v5 }
 0x457   :  { %v1080_v9 = vsel %vm1079_vm1, %v1433_v62, %v1076_v7 }
 0x458   :  { %v1081_v10 = vmul.f32 %v1080_v9, %v941_v6 }
 0x45a   :  { %v1085_v11 = vperm.slane %v1081_v10, 0  ;;  %v1082_v12 = vmul.f32 %v1081_v10, %v1065_v53 }
 0x45c   :  { %1092 = vrot.lane.b32.xlu2 %v1085_v11, %s1559_s12  ;;  %1089 = vrot.lane.b32.xlu1 %v1085_v11, %s1541_s14  ;;  %v1083_v8 = vsub.f32 %v942_v13, %v1082_v12 }
 0x45d   :  { %1086 = vrot.lane.b32.xlu0 %v1085_v11, %s1538_s10 }
 0x45e   :  { %v1147_v14 = vperm.slane %v1083_v8, 0 }
 0x464   :  { %1101 = vrot.lane.b32.xlu2 %v1085_v11, %s1560_s1  ;;  %1098 = vrot.lane.b32.xlu1 %v1085_v11, %s1562_s2 }
 0x465   :  { %1095 = vrot.lane.b32.xlu0 %v1085_v11, %s1561_s15 }
 0x46c   :  { %1110 = vrot.lane.b32.xlu2 %v1085_v11, %s1563_s16  ;;  %1107 = vrot.lane.b32.xlu1 %v1085_v11, %s1565_s17 }
 0x46d   :  { %1104 = vrot.lane.b32.xlu0 %v1085_v11, %s1564_s0 }
 0x474   :  { %1119 = vrot.lane.b32.xlu2 %v1085_v11, %s1566_s9  ;;  %1113 = vrot.lane.b32.xlu1 %v1085_v11, %s1567_s11 }
 0x475   :  { %1116 = vrot.lane.b32.xlu0 %v1085_v11, %s1568_s13 }
 0x47c   :  { %1128 = vrot.lane.b32.xlu2 %v1085_v11, %s1569_s29  ;;  %1122 = vrot.lane.b32.xlu1 %v1085_v11, %s1570_s28 }
 0x47d   :  { %1125 = vrot.lane.b32.xlu0 %v1085_v11, %s2027_s21 }
 0x484   :  { %1154 = vrot.lane.b32.xlu2 %v1147_v14, %s1559_s12  ;;  %1151 = vrot.lane.b32.xlu1 %v1147_v14, %s1541_s14 }
 0x485   :  { %1148 = vrot.lane.b32.xlu0 %v1147_v14, %s1538_s10  ;;  %s1238_s10 = sshll.u32 %s1572_s6, 4  ;;  %s1239_s10 = int_to_ptr.vmem [resolvable:$true] %s1238_s10 }
 0x48c   :  { %1163 = vrot.lane.b32.xlu2 %v1147_v14, %s1560_s1  ;;  %1160 = vrot.lane.b32.xlu1 %v1147_v14, %s1562_s2 }
 0x48d   :  { %1157 = vrot.lane.b32.xlu0 %v1147_v14, %s1561_s15 }
 0x494   :  { %1169 = vrot.lane.b32.xlu2 %v1147_v14, %s1565_s17  ;;  %1172 = vrot.lane.b32.xlu1 %v1147_v14, %s1563_s16 }
 0x495   :  { %1166 = vrot.lane.b32.xlu0 %v1147_v14, %s1564_s0 }
 0x49c   :  { %1178 = vrot.lane.b32.xlu2 %v1147_v14, %s1568_s13  ;;  %1181 = vrot.lane.b32.xlu1 %v1147_v14, %s1566_s9 }
 0x49d   :  { %1175 = vrot.lane.b32.xlu0 %v1147_v14, %s1567_s11 }
 0x4a4   :  { %1190 = vrot.lane.b32.xlu2 %v1147_v14, %s1569_s29  ;;  %1187 = vrot.lane.b32.xlu1 %v1147_v14, %s2027_s21 }
 0x4a5   :  { %1184 = vrot.lane.b32.xlu0 %v1147_v14, %s1570_s28 }
 0x4b6   :  { %v1093_v15 = vpop.permute.xlu2 %1092 }
 0x4be   :  { %v1102_v16 = vpop.permute.xlu2 %1101 }
 0x4c6   :  { %v1111_v19 = vpop.permute.xlu2 %1110 }
 0x4ce   :  { %v1090_v17 = vpop.permute.xlu1 %1089  ;;  %v1120_v22 = vpop.permute.xlu2 %1119 }
 0x4cf   :  { %v1087_v18 = vpop.permute.xlu0 %1086 }
 0x4d0   :  { %v1131_v29 = vsel %vm532_vm7, %v1081_v10, %v1087_v18 }
 0x4d1   :  { %v1132_v31 = vsel %vm534_vm8, %v1131_v29, %v1090_v17 }
 0x4d2   :  { %v1133_v33 = vsel %vm536_vm9, %v1132_v31, %v1093_v15 }
 0x4d6   :  { %v1099_v20 = vpop.permute.xlu1 %1098  ;;  %v1129_v3 = vpop.permute.xlu2 %1128 }
 0x4d7   :  { %v1096_v21 = vpop.permute.xlu0 %1095 }
 0x4d8   :  { %v1134_v35 = vsel %vm538_vm10, %v1133_v33, %v1096_v21 }
 0x4d9   :  { %v1135_v36 = vsel %vm540_vm11, %v1134_v35, %v1099_v20  ;;  %v1214_v20 = vld [vmem:[#allocation4] sm:$0xff] }
 0x4da   :  { %v1136_v39 = vsel %vm2028_vm12, %v1135_v36, %v1102_v16 }
 0x4de   :  { %v1108_v60 = vpop.permute.xlu1 %1107  ;;  %v1155_v30 = vpop.permute.xlu2 %1154 }
 0x4df   :  { %v1105_v23 = vpop.permute.xlu0 %1104 }
 0x4e0   :  { %v1137_v41 = vsel %vm544_vm13, %v1136_v39, %v1105_v23  ;;  %v1227_v23 = vld [vmem:[#allocation4 + $0x18] sm:$0xff] }
 0x4e1   :  { %v1138_v44 = vsel %vm546_vm14, %v1137_v41, %v1108_v60  ;;  %v1226_v60 = vld [vmem:[#allocation4 + $0x10] sm:$0xff] }
 0x4e2   :  { %v1139_v46 = vsel %vm548_vm15, %v1138_v44, %v1111_v19 }
 0x4e6   :  { %v1114_v1 = vpop.permute.xlu1 %1113  ;;  %v1164_v37 = vpop.permute.xlu2 %1163 }
 0x4e7   :  { %v1117_v25 = vpop.permute.xlu0 %1116  ;;  %v1140_v49 = vsel %vm550_vm2, %v1139_v46, %v1114_v1 }
 0x4e8   :  { %v1141_v53 = vsel %vm552_vm3, %v1140_v49, %v1117_v25 }
 0x4e9   :  { %v1142_v56 = vsel %vm554_vm4, %v1141_v53, %v1120_v22  ;;  %v1215_v22 = vld [vmem:[#allocation4 + $0x8] sm:$0xff] }
 0x4ee   :  { %v1123_v26 = vpop.permute.xlu1 %1122  ;;  %v1170_v48 = vpop.permute.xlu2 %1169 }
 0x4ef   :  { %v1126_v27 = vpop.permute.xlu0 %1125 }
 0x4f6   :  { %v1152_v32 = vpop.permute.xlu1 %1151  ;;  %v1179_v62 = vpop.permute.xlu2 %1178 }
 0x4f7   :  { %v1149_v34 = vpop.permute.xlu0 %1148 }
 0x4f8   :  { %v1193_v38 = vsel %vm532_vm7, %v1083_v8, %v1149_v34  ;;  %vm2029_vm7 = vmmov %vm2028_vm12 }
 0x4f9   :  { %v1194_v42 = vsel %vm534_vm8, %v1193_v38, %v1152_v32  ;;  %vm2030_vm8 = vcmask 424960  }
 0x4fa   :  { %v1195_v45 = vsel %vm536_vm9, %v1194_v42, %v1155_v30  ;;  %v1143_v57 = vsel %vm2030_vm8, %v1142_v56, %v1123_v26  ;;  %vm2031_vm9 = vcmask 457728  }
 0x4fb   :  { %v1144_v2 = vsel %vm2031_vm9, %v1143_v57, %v1126_v27 }
 0x4fe   :  { %v1161_v40 = vpop.permute.xlu1 %1160  ;;  %v1191_v8 = vpop.permute.xlu2 %1190 }
 0x4ff   :  { %v1158_v43 = vpop.permute.xlu0 %1157 }
 0x500   :  { %v1196_v47 = vsel %vm538_vm10, %v1195_v45, %v1158_v43  ;;  %vm2032_vm10 = vcmask 490496  }
 0x501   :  { %v1197_v50 = vsel %vm540_vm11, %v1196_v47, %v1161_v40  ;;  %v1145_v6 = vsel %vm2032_vm10, %v1144_v2, %v1129_v3  ;;  %vm2033_vm11 = vmmov %vm2030_vm8 }
 0x502   :  { %v1198_v54 = vsel %vm2029_vm7, %v1197_v50, %v1164_v37  ;;  %v1208_v9 = vperm.slane %v1145_v6, 0 }
 0x504   :  { %v1210_v15 = vmul.f32 %v1208_v9, %v1861_v59  ;;  %v1211_v17 = vmul.f32 %v1208_v9, %v1858_v24  ;;  %v1222_v18 = vmul.f32 %v1208_v9, %v1863_v63  ;;  %v1223_v19 = vmul.f32 %v1208_v9, %v1871_v28 }
 0x506   :  { %v1173_v51 = vpop.permute.xlu1 %1172 }
 0x507   :  { %v1167_v52 = vpop.permute.xlu0 %1166 }
 0x508   :  { %v1199_v55 = vsel %vm544_vm13, %v1198_v54, %v1167_v52  ;;  %vm2034_vm13 = vmmov %vm2031_vm9 }
 0x509   :  { %v1200_v58 = vsel %vm546_vm14, %v1199_v55, %v1170_v48  ;;  %vm2035_vm14 = vmmov %vm2032_vm10 }
 0x50a   :  { %v1201_v4 = vsel %vm548_vm15, %v1200_v58, %v1173_v51 }
 0x50e   :  { %v1182_v61 = vpop.permute.xlu1 %1181 }
 0x50f   :  { %v1176_v0 = vpop.permute.xlu0 %1175 }
 0x510   :  { %v1202_v5 = vsel %vm550_vm2, %v1201_v4, %v1176_v0 }
 0x511   :  { %v1203_v7 = vsel %vm552_vm3, %v1202_v5, %v1179_v62 }
 0x512   :  { %v1204_v11 = vsel %vm554_vm4, %v1203_v7, %v1182_v61 }
 0x516   :  { %v1188_v10 = vpop.permute.xlu1 %1187 }
 0x517   :  { %v1185_v12 = vpop.permute.xlu0 %1184 }
 0x518   :  { %v1205_v13 = vsel %vm2033_vm11, %v1204_v11, %v1185_v12 }
 0x519   :  { %v1206_v14 = vsel %vm2034_vm13, %v1205_v13, %v1188_v10 }
 0x51a   :  { %v1207_v16 = vsel %vm2035_vm14, %v1206_v14, %v1191_v8 }
 0x51b   :  { %v1209_v21 = vperm.slane %v1207_v16, 0 }
 0x51d   :  { %v1212_v1 = vadd.f32 %v1210_v15, %v1209_v21  ;;  %v1213_v3 = vadd.f32 %v1211_v17, %v1209_v21  ;;  %v1224_v25 = vadd.f32 %v1222_v18, %v1209_v21  ;;  %v1225_v26 = vadd.f32 %v1223_v19, %v1209_v21 }
 0x51f   :  { %v1216_v27 = vadd.f32 %v1214_v20, %v1212_v1  ;;  %v1217_v29 = vadd.f32 %v1215_v22, %v1213_v3  ;;  %v1228_v59 = vadd.f32 %v1226_v60, %v1224_v25  ;;  %v1229_v30 = vadd.f32 %v1227_v23, %v1225_v26 }
 0x521   :  { %v1218_v31 = vmax.f32 %v1216_v27, 0.0  ;;  %v1219_v32 = vmax.f32 %v1217_v29, 0.0  ;;  %v1230_v24 = vmax.f32 %v1228_v59, 0.0  ;;  %v1231_v63 = vmax.f32 %v1229_v30, 0.0 }
 0x523   :  { %1220 = vst.msk [vmem:[#allocation10] sm:$0xff] %vm119_vm0, %v1218_v31 }
 0x524   :  { %1221 = vst.msk [vmem:[#allocation10 + $0x8] sm:$0xff] %vm119_vm0, %v1219_v32 }
 0x525   :  { %1232 = vst.msk [vmem:[#allocation10 + $0x10] sm:$0xff] %vm119_vm0, %v1230_v24 }
 0x526   :  { %1233 = vst.msk [vmem:[#allocation10 + $0x18] sm:$0xff] %vm119_vm0, %v1231_v63 }
 0x527   :  { %1246 = dma.vmem_to_hbm [thread:$0]  %s1239_s10, 512, %s1241_s23, [#allocation6], %s2036_s24, %s2036_s24, %s1541_s14  }
 0x528   :  { %1534 = dma.done.wait [#allocation6], 512  }
 0x529   :  { %1535 = vsyncadd [#allocation6], 4294966784 }
 0x52a   :  { %1251 = vsyncpa [#allocation5], 1 }
 0x52b   :  { %1252 = vsyncpa [#allocation8], 1 }
 0x52c   :  { %1253 = vsyncpa [#allocation6], 1 }

</bundles_post_ra>
